<compile_context>
chip_gen: v6e
topology: v6e:2x2x1
jax: 0.10.0
libtpu: 0.0.40
codegen_flags: <defaults>
</compile_context>

<pallas_src>
import functools

import jax
import jax.numpy as jnp
import numpy as np
from jax import lax
from jax.experimental import pallas as pl
from jax.experimental.pallas import tpu as pltpu

# bf16 matmul operands: full-rate MXU on v5e/v6e/v7x, half the im2col scratch.
# All statistics / normalization / pooling stay in f32 inside the kernel.
DEFAULT_COMPUTE_DTYPE = jnp.bfloat16

_TAPS = tuple((dy, dx) for dy in range(3) for dx in range(3))


def _round_up(x, m):
    return (x + m - 1) // m * m


def _build_tap_masks(N, H, W):
    """(9, N*H*W) float 0/1 validity mask per 3x3 tap.

    Zeroes both the 1-pixel 'SAME' halo and any cross-image leakage; these are exactly
    the lanes where a circular pltpu.roll of the flattened buffer would wrap, so
    roll + mask-multiply reproduces zero padding with a single full-width store.
    """
    NHW = N * H * W
    idx = np.arange(NHW)
    h = (idx // W) % H
    w = idx % W
    masks = np.zeros((9, NHW), dtype=np.float32)
    for t, (dy, dx) in enumerate(_TAPS):
        hs = h + (dy - 1)
        ws = w + (dx - 1)
        masks[t] = ((hs >= 0) & (hs < H) & (ws >= 0) & (ws < W)).astype(np.float32)
    return masks


def _build_pool_select(N, H, W):
    """(N*H*W, N*Hh*Wh) block-diagonal one-hot: column j picks the flat index of the
    top-left pixel of pool window j, so the whole stride-2 lane compaction is ONE
    matmul on the otherwise-idle MXU followed by one full-width store."""
    Hh, Wh = H // 2, W // 2
    HW, HhWh = H * W, Hh * Wh
    sel = np.zeros((N * HW, N * HhWh), dtype=np.float32)
    j = np.arange(N * HhWh)
    n, jj = j // HhWh, j % HhWh
    src = n * HW + (jj // Wh) * (2 * W) + (jj % Wh) * 2
    sel[src, j] = 1.0
    return sel


def _im2col_into(p_ref, x, masks_ref, C, W, NHW):
    """Write the (9*C, NHW) im2col patch matrix of x (C, NHW) into p_ref.

    Tap (dy, dx) at output position i reads input position i + o with
    o = (dy-1)*W + (dx-1): realised as a lane roll (XLU) times the precomputed halo
    mask -- one unmasked full-width store per tap, no zero broadcasts.
    """
    for t, (dy, dx) in enumerate(_TAPS):
        o = (dy - 1) * W + (dx - 1)
        r0 = t * C
        if o == 0:
            p_ref[r0:r0 + C, :] = x                      # centre tap: mask is all-true
        else:
            rolled = pltpu.roll(x, shift=(-o) % NHW, axis=1)
            p_ref[r0:r0 + C, :] = rolled * masks_ref[t:t + 1, :]


def _bn_relu(y, gamma, beta, inv_count, eps=1e-5):
    """Training-mode BatchNorm2d (+ReLU) folded to one per-channel scale/shift pass.

    y is f32; sums/variance stay f32 even when matmul operands are bf16."""
    s = jnp.sum(y, axis=1, keepdims=True)
    sq = jnp.sum(y * y, axis=1, keepdims=True)
    mean = s * inv_count
    var = sq * inv_count - mean * mean                   # biased variance, like torch
    scale = gamma * lax.rsqrt(var + eps)
    shift = beta - mean * scale
    return jnp.maximum(y * scale + shift, 0.0)


def down_transition_kernel(x_ref, masks_ref, w1_ref, g1_ref, bt1_ref,
                           w2_ref, g2_ref, bt2_ref, sel_ref,
                           out_ref, p_ref, *, N, H, W, Cinp, Coutp, compute_dtype):
    NHW = N * H * W
    inv = 1.0 / NHW
    cdt = compute_dtype

    # ---- conv1: one (Coutp, 9*Cinp) @ (9*Cinp, NHW) MXU matmul (bias folded in BN) --
    _im2col_into(p_ref, x_ref[...], masks_ref, Cinp, W, NHW)
    y1 = jnp.dot(w1_ref[...], p_ref[0:9 * Cinp, :],
                 preferred_element_type=jnp.float32)     # (Coutp, NHW) f32
    h1 = _bn_relu(y1, g1_ref[...], bt1_ref[...], inv)

    # ---- conv2 (reuses the same im2col scratch; p_ref is dead after the dot above) --
    _im2col_into(p_ref, h1.astype(cdt), masks_ref, Coutp, W, NHW)
    y2 = jnp.dot(w2_ref[...], p_ref[0:9 * Coutp, :],
                 preferred_element_type=jnp.float32)     # (Coutp, NHW) f32
    h2 = _bn_relu(y2, g2_ref[...], bt2_ref[...], inv)

    # ---- 2x2 max-pool (stride 2): roll-based pairwise maxima (full width, XLU) ------
    # At every pool top-left position (even h < H-1, even w < W-1) neither roll wraps
    # across an image/buffer boundary; wrapped lanes are never selected by sel.
    m1 = jnp.maximum(h2, pltpu.roll(h2, shift=NHW - 1, axis=1))
    m2 = jnp.maximum(m1, pltpu.roll(m1, shift=NHW - W, axis=1))

    # Block-diagonal one-hot compaction: one matmul, one full-width lane-dense store.
    pooled = jnp.dot(m2, sel_ref[...], preferred_element_type=jnp.float32)
    out_ref[...] = pooled.astype(out_ref.dtype)


def down_transition(x_nchw, params, *, compute_dtype=DEFAULT_COMPUTE_DTYPE):
    """Fused DownTransition forward. x_nchw: (N, Cin, H, W), like PyTorch."""
    N, Cin, H, W = x_nchw.shape
    Cout = params["w1"].shape[-1]
    assert H % 2 == 0 and W % 2 == 0, "MaxPool2d(2) requires even H and W"
    NHW = N * H * W
    Hh, Wh = H // 2, W // 2
    HhWh = Hh * Wh

    # Pad channel counts to a full sublane tile (8 rows f32 / 16 rows bf16) so every
    # im2col tap-block store is unmasked-aligned.  Padded channels carry zero weights
    # (+ zero gamma/beta) and therefore stay identically zero through conv/BN/ReLU.
    align = 32 // jnp.dtype(compute_dtype).itemsize
    Cinp = _round_up(Cin, align)
    Coutp = _round_up(Cout, align)
    Cmax = max(Cinp, Coutp)

    # Lane-dense channels-first layout: (C, N*H*W) puts the big flattened-spatial axis
    # on the 128-lane dim. Cast once, here.
    x_flat = jnp.transpose(x_nchw, (1, 0, 2, 3)).reshape(Cin, NHW)
    x_flat = jnp.pad(x_flat, ((0, Cinp - Cin), (0, 0))).astype(compute_dtype)

    # Conv weights as matmul operands (column order = tap-major, in-channel-minor,
    # matching the im2col rows). Conv biases are intentionally NOT passed: the
    # batch-mean subtraction of the following BatchNorm cancels them exactly.
    w1p = jnp.pad(params["w1"], ((0, 0), (0, 0), (0, Cinp - Cin), (0, Coutp - Cout)))
    w1m = w1p.reshape(9 * Cinp, Coutp).T.astype(compute_dtype)
    w2p = jnp.pad(params["w2"], ((0, 0), (0, 0), (0, Coutp - Cout), (0, Coutp - Cout)))
    w2m = w2p.reshape(9 * Coutp, Coutp).T.astype(compute_dtype)

    def _pad_vec(v):
        return jnp.pad(v.reshape(-1), (0, Coutp - Cout)).reshape(Coutp, 1).astype(jnp.float32)

    g1, bt1 = _pad_vec(params["g1"]), _pad_vec(params["bt1"])
    g2, bt2 = _pad_vec(params["g2"]), _pad_vec(params["bt2"])

    # Host-side constants (no in-kernel iota/compare work on the VALU slot).
    masks = jnp.asarray(_build_tap_masks(N, H, W), dtype=compute_dtype)   # (9, NHW)
    sel = jnp.asarray(_build_pool_select(N, H, W))                        # (NHW, N*HhWh) f32

    kernel = functools.partial(down_transition_kernel, N=N, H=H, W=W,
                               Cinp=Cinp, Coutp=Coutp, compute_dtype=compute_dtype)
    vmem = pl.BlockSpec(memory_space=pltpu.MemorySpace.VMEM)
    out_flat = pl.pallas_call(
        kernel,
        out_shape=jax.ShapeDtypeStruct((Coutp, N * HhWh), x_nchw.dtype),
        in_specs=[vmem] * 9,
        out_specs=vmem,
        scratch_shapes=[
            # Single im2col buffer, shared by both convs (never live simultaneously).
            pltpu.VMEM((9 * Cmax, NHW), compute_dtype),
        ],
        # Resident footprint at demo shapes is <1 MiB; explicit budget keeps it well
        # inside v5e's 16 MiB default scoped VMEM and v7x's 64 MiB physical VMEM.
        compiler_params=pltpu.CompilerParams(vmem_limit_bytes=32 * 1024 * 1024),
    )(x_flat, masks, w1m, g1, bt1, w2m, g2, bt2, sel)

    out = jnp.transpose(out_flat.reshape(Coutp, N, Hh, Wh), (1, 0, 2, 3))
    return out[:, :Cout]                                 # drop zero-padded channels


def ref_down_transition(x_nchw, p):
    # Pure-JAX reference (same semantics, biases included) for verification.
    x = jnp.transpose(x_nchw, (0, 2, 3, 1))

    def conv_bn_relu(x, w, b, g, bt):
        y = lax.conv_general_dilated(x, w, (1, 1), "SAME",
                                     dimension_numbers=("NHWC", "HWIO", "NHWC"))
        y = y + b.reshape(1, 1, 1, -1)
        mean = jnp.mean(y, axis=(0, 1, 2), keepdims=True)
        var = jnp.mean((y - mean) ** 2, axis=(0, 1, 2), keepdims=True)
        y = (y - mean) / jnp.sqrt(var + 1e-5)
        y = y * g.reshape(1, 1, 1, -1) + bt.reshape(1, 1, 1, -1)
        return jnp.maximum(y, 0.0)

    y = conv_bn_relu(x, p["w1"], p["b1"], p["g1"], p["bt1"])
    y = conv_bn_relu(y, p["w2"], p["b2"], p["g2"], p["bt2"])
    y = lax.reduce_window(y, -jnp.inf, lax.max, (1, 2, 2, 1), (1, 2, 2, 1), "VALID")
    return jnp.transpose(y, (0, 3, 1, 2))


if __name__ == "__main__":
    key = jax.random.PRNGKey(0)
    N, Cin, H, W = 2, 4, 16, 16
    Cout = 2 * Cin                                       # DownTransition: out = 2 * in
    k0, k1, k2, k3, kx = jax.random.split(key, 5)

    params = {
        # Conv weights in HWIO (= torch (Cout,Cin,3,3) permuted); deterministic init.
        "w1": 0.1 * jax.random.normal(k0, (3, 3, Cin, Cout), jnp.float32),
        "b1": 0.1 * jax.random.normal(k1, (Cout,), jnp.float32),
        "g1": jnp.ones((Cout,), jnp.float32),            # BN gamma (torch default)
        "bt1": jnp.zeros((Cout,), jnp.float32),          # BN beta  (torch default)
        "w2": 0.1 * jax.random.normal(k2, (3, 3, Cout, Cout), jnp.float32),
        "b2": 0.1 * jax.random.normal(k3, (Cout,), jnp.float32),
        "g2": jnp.ones((Cout,), jnp.float32),
        "bt2": jnp.zeros((Cout,), jnp.float32),
    }
    x = jax.random.normal(kx, (N, Cin, H, W), jnp.float32)   # NCHW, like PyTorch

    ref = ref_down_transition(x, params)

    # f32-operand run: bit-for-bit semantics check against the pure-JAX reference.
    out_f32 = jax.block_until_ready(
        down_transition(x, params, compute_dtype=jnp.float32))
    assert out_f32.shape == (N, Cout, H // 2, W // 2), out_f32.shape
    np.testing.assert_allclose(np.asarray(out_f32), np.asarray(ref),
                               rtol=5e-4, atol=5e-4)

    # Default (bf16 matmul-operand) run: loosened tolerance per bf16 precision.
    out = jax.block_until_ready(down_transition(x, params))
    assert out.shape == (N, Cout, H // 2, W // 2), out.shape
    np.testing.assert_allclose(np.asarray(out), np.asarray(ref),
                               rtol=5e-2, atol=5e-2)

    print("KERNEL_OK")
</pallas_src>

<mosaic_0001>
module attributes {stable_mosaic.version = 11 : i64} {
  func.func @down_transition_kernel(%arg0: memref<8x512xf32, #tpu.memory_space<vmem>>, %arg1: memref<9x512xf32, #tpu.memory_space<vmem>>, %arg2: memref<8x72xf32, #tpu.memory_space<vmem>>, %arg3: memref<8x1xf32, #tpu.memory_space<vmem>>, %arg4: memref<8x1xf32, #tpu.memory_space<vmem>>, %arg5: memref<8x72xf32, #tpu.memory_space<vmem>>, %arg6: memref<8x1xf32, #tpu.memory_space<vmem>>, %arg7: memref<8x1xf32, #tpu.memory_space<vmem>>, %arg8: memref<512x128xf32, #tpu.memory_space<vmem>>, %arg9: memref<8x128xf32, #tpu.memory_space<vmem>>, %arg10: memref<72x512xf32, #tpu.memory_space<vmem>>) attributes {dimension_semantics = [], scalar_prefetch = 0 : i64, scratch_operands = 1 : i64, tpu.core_type = #tpu.core_type<tc>} {
    %c0 = arith.constant 0 : index
    %c0_0 = arith.constant 0 : index
    %0 = vector.load %arg0[%c0, %c0_0] : memref<8x512xf32, #tpu.memory_space<vmem>>, vector<8x512xf32>
    %c17_i32 = arith.constant 17 : i32
    %1 = tpu.dynamic_rotate %0 by %c17_i32 dim 1 : vector<8x512xf32>, i32 -> vector<8x512xf32>
    %c0_1 = arith.constant 0 : index
    %c0_2 = arith.constant 0 : index
    %2 = vector.load %arg1[%c0_1, %c0_2] : memref<9x512xf32, #tpu.memory_space<vmem>>, vector<1x512xf32>
    %3 = vector.broadcast %2 : vector<1x512xf32> to vector<8x512xf32>
    %4 = arith.mulf %1, %3 : vector<8x512xf32>
    %c0_3 = arith.constant 0 : index
    %c0_4 = arith.constant 0 : index
    %5 = vector.load %arg10[%c0_3, %c0_4] : memref<72x512xf32, #tpu.memory_space<vmem>>, vector<8x512xf32>
    tpu.vector_store %arg10[%c0_3, %c0_4], %4 {strides = array<i32>} : memref<72x512xf32, #tpu.memory_space<vmem>>, vector<8x512xf32>,
    %c16_i32 = arith.constant 16 : i32
    %6 = tpu.dynamic_rotate %0 by %c16_i32 dim 1 : vector<8x512xf32>, i32 -> vector<8x512xf32>
    %c1 = arith.constant 1 : index
    %c0_5 = arith.constant 0 : index
    %7 = vector.load %arg1[%c1, %c0_5] : memref<9x512xf32, #tpu.memory_space<vmem>>, vector<1x512xf32>
    %8 = vector.broadcast %7 : vector<1x512xf32> to vector<8x512xf32>
    %9 = arith.mulf %6, %8 : vector<8x512xf32>
    %c8 = arith.constant 8 : index
    %c0_6 = arith.constant 0 : index
    %10 = vector.load %arg10[%c8, %c0_6] : memref<72x512xf32, #tpu.memory_space<vmem>>, vector<8x512xf32>
    tpu.vector_store %arg10[%c8, %c0_6], %9 {strides = array<i32>} : memref<72x512xf32, #tpu.memory_space<vmem>>, vector<8x512xf32>,
    %c15_i32 = arith.constant 15 : i32
    %11 = tpu.dynamic_rotate %0 by %c15_i32 dim 1 : vector<8x512xf32>, i32 -> vector<8x512xf32>
    %c2 = arith.constant 2 : index
    %c0_7 = arith.constant 0 : index
    %12 = vector.load %arg1[%c2, %c0_7] : memref<9x512xf32, #tpu.memory_space<vmem>>, vector<1x512xf32>
    %13 = vector.broadcast %12 : vector<1x512xf32> to vector<8x512xf32>
    %14 = arith.mulf %11, %13 : vector<8x512xf32>
    %c16 = arith.constant 16 : index
    %c0_8 = arith.constant 0 : index
    %15 = vector.load %arg10[%c16, %c0_8] : memref<72x512xf32, #tpu.memory_space<vmem>>, vector<8x512xf32>
    tpu.vector_store %arg10[%c16, %c0_8], %14 {strides = array<i32>} : memref<72x512xf32, #tpu.memory_space<vmem>>, vector<8x512xf32>,
    %c1_i32 = arith.constant 1 : i32
    %16 = tpu.dynamic_rotate %0 by %c1_i32 dim 1 : vector<8x512xf32>, i32 -> vector<8x512xf32>
    %c3 = arith.constant 3 : index
    %c0_9 = arith.constant 0 : index
    %17 = vector.load %arg1[%c3, %c0_9] : memref<9x512xf32, #tpu.memory_space<vmem>>, vector<1x512xf32>
    %18 = vector.broadcast %17 : vector<1x512xf32> to vector<8x512xf32>
    %19 = arith.mulf %16, %18 : vector<8x512xf32>
    %c24 = arith.constant 24 : index
    %c0_10 = arith.constant 0 : index
    %20 = vector.load %arg10[%c24, %c0_10] : memref<72x512xf32, #tpu.memory_space<vmem>>, vector<8x512xf32>
    tpu.vector_store %arg10[%c24, %c0_10], %19 {strides = array<i32>} : memref<72x512xf32, #tpu.memory_space<vmem>>, vector<8x512xf32>,
    %c32 = arith.constant 32 : index
    %c0_11 = arith.constant 0 : index
    %21 = vector.load %arg10[%c32, %c0_11] : memref<72x512xf32, #tpu.memory_space<vmem>>, vector<8x512xf32>
    tpu.vector_store %arg10[%c32, %c0_11], %0 {strides = array<i32>} : memref<72x512xf32, #tpu.memory_space<vmem>>, vector<8x512xf32>,
    %c511_i32 = arith.constant 511 : i32
    %22 = tpu.dynamic_rotate %0 by %c511_i32 dim 1 : vector<8x512xf32>, i32 -> vector<8x512xf32>
    %c5 = arith.constant 5 : index
    %c0_12 = arith.constant 0 : index
    %23 = vector.load %arg1[%c5, %c0_12] : memref<9x512xf32, #tpu.memory_space<vmem>>, vector<1x512xf32>
    %24 = vector.broadcast %23 : vector<1x512xf32> to vector<8x512xf32>
    %25 = arith.mulf %22, %24 : vector<8x512xf32>
    %c40 = arith.constant 40 : index
    %c0_13 = arith.constant 0 : index
    %26 = vector.load %arg10[%c40, %c0_13] : memref<72x512xf32, #tpu.memory_space<vmem>>, vector<8x512xf32>
    tpu.vector_store %arg10[%c40, %c0_13], %25 {strides = array<i32>} : memref<72x512xf32, #tpu.memory_space<vmem>>, vector<8x512xf32>,
    %c497_i32 = arith.constant 497 : i32
    %27 = tpu.dynamic_rotate %0 by %c497_i32 dim 1 : vector<8x512xf32>, i32 -> vector<8x512xf32>
    %c6 = arith.constant 6 : index
    %c0_14 = arith.constant 0 : index
    %28 = vector.load %arg1[%c6, %c0_14] : memref<9x512xf32, #tpu.memory_space<vmem>>, vector<1x512xf32>
    %29 = vector.broadcast %28 : vector<1x512xf32> to vector<8x512xf32>
    %30 = arith.mulf %27, %29 : vector<8x512xf32>
    %c48 = arith.constant 48 : index
    %c0_15 = arith.constant 0 : index
    %31 = vector.load %arg10[%c48, %c0_15] : memref<72x512xf32, #tpu.memory_space<vmem>>, vector<8x512xf32>
    tpu.vector_store %arg10[%c48, %c0_15], %30 {strides = array<i32>} : memref<72x512xf32, #tpu.memory_space<vmem>>, vector<8x512xf32>,
    %c496_i32 = arith.constant 496 : i32
    %32 = tpu.dynamic_rotate %0 by %c496_i32 dim 1 : vector<8x512xf32>, i32 -> vector<8x512xf32>
    %c7 = arith.constant 7 : index
    %c0_16 = arith.constant 0 : index
    %33 = vector.load %arg1[%c7, %c0_16] : memref<9x512xf32, #tpu.memory_space<vmem>>, vector<1x512xf32>
    %34 = vector.broadcast %33 : vector<1x512xf32> to vector<8x512xf32>
    %35 = arith.mulf %32, %34 : vector<8x512xf32>
    %c56 = arith.constant 56 : index
    %c0_17 = arith.constant 0 : index
    %36 = vector.load %arg10[%c56, %c0_17] : memref<72x512xf32, #tpu.memory_space<vmem>>, vector<8x512xf32>
    tpu.vector_store %arg10[%c56, %c0_17], %35 {strides = array<i32>} : memref<72x512xf32, #tpu.memory_space<vmem>>, vector<8x512xf32>,
    %c495_i32 = arith.constant 495 : i32
    %37 = tpu.dynamic_rotate %0 by %c495_i32 dim 1 : vector<8x512xf32>, i32 -> vector<8x512xf32>
    %c8_18 = arith.constant 8 : index
    %c0_19 = arith.constant 0 : index
    %38 = vector.load %arg1[%c8_18, %c0_19] : memref<9x512xf32, #tpu.memory_space<vmem>>, vector<1x512xf32>
    %39 = vector.broadcast %38 : vector<1x512xf32> to vector<8x512xf32>
    %40 = arith.mulf %37, %39 : vector<8x512xf32>
    %c64 = arith.constant 64 : index
    %c0_20 = arith.constant 0 : index
    %41 = vector.load %arg10[%c64, %c0_20] : memref<72x512xf32, #tpu.memory_space<vmem>>, vector<8x512xf32>
    tpu.vector_store %arg10[%c64, %c0_20], %40 {strides = array<i32>} : memref<72x512xf32, #tpu.memory_space<vmem>>, vector<8x512xf32>,
    %c0_21 = arith.constant 0 : index
    %c0_22 = arith.constant 0 : index
    %42 = vector.load %arg2[%c0_21, %c0_22] : memref<8x72xf32, #tpu.memory_space<vmem>>, vector<8x72xf32>
    %c0_23 = arith.constant 0 : index
    %c0_24 = arith.constant 0 : index
    %43 = vector.load %arg10[%c0_23, %c0_24] : memref<72x512xf32, #tpu.memory_space<vmem>>, vector<72x512xf32>
    %cst = arith.constant dense<0.000000e+00> : vector<8x512xf32>
    %44 = tpu.matmul %42, %43, %cst {dimension_numbers = #tpu.dot_dimension_numbers<[1], [0], [0], [1], [0, 0, 1, 1], [], []>} : vector<8x72xf32>, vector<72x512xf32>, vector<8x512xf32> -> vector<8x512xf32>
    %c0_25 = arith.constant 0 : index
    %c0_26 = arith.constant 0 : index
    %45 = vector.load %arg3[%c0_25, %c0_26] : memref<8x1xf32, #tpu.memory_space<vmem>>, vector<8x1xf32>
    %c0_27 = arith.constant 0 : index
    %c0_28 = arith.constant 0 : index
    %46 = vector.load %arg4[%c0_27, %c0_28] : memref<8x1xf32, #tpu.memory_space<vmem>>, vector<8x1xf32>
    %cst_29 = arith.constant dense<0.000000e+00> : vector<8xf32>
    %47 = vector.multi_reduction <add>, %44, %cst_29 [1] : vector<8x512xf32> to vector<8xf32>
    %48 = vector.shape_cast %47 : vector<8xf32> to vector<8x1xf32>
    %49 = arith.mulf %44, %44 : vector<8x512xf32>
    %cst_30 = arith.constant dense<0.000000e+00> : vector<8xf32>
    %50 = vector.multi_reduction <add>, %49, %cst_30 [1] : vector<8x512xf32> to vector<8xf32>
    %51 = vector.shape_cast %50 : vector<8xf32> to vector<8x1xf32>
    %cst_31 = arith.constant 0.001953125 : f32
    %52 = vector.broadcast %cst_31 : f32 to vector<8x1xf32>
    %53 = arith.mulf %48, %52 : vector<8x1xf32>
    %cst_32 = arith.constant 0.001953125 : f32
    %54 = vector.broadcast %cst_32 : f32 to vector<8x1xf32>
    %55 = arith.mulf %51, %54 : vector<8x1xf32>
    %56 = arith.mulf %53, %53 : vector<8x1xf32>
    %57 = arith.subf %55, %56 : vector<8x1xf32>
    %cst_33 = arith.constant 9.99999974E-6 : f32
    %58 = vector.broadcast %cst_33 : f32 to vector<8x1xf32>
    %59 = arith.addf %57, %58 : vector<8x1xf32>
    %60 = math.rsqrt %59 : vector<8x1xf32>
    %61 = arith.mulf %45, %60 : vector<8x1xf32>
    %62 = arith.mulf %53, %61 : vector<8x1xf32>
    %63 = arith.subf %46, %62 : vector<8x1xf32>
    %64 = vector.broadcast %61 : vector<8x1xf32> to vector<8x512xf32>
    %65 = arith.mulf %44, %64 : vector<8x512xf32>
    %66 = vector.broadcast %63 : vector<8x1xf32> to vector<8x512xf32>
    %67 = arith.addf %65, %66 : vector<8x512xf32>
    %cst_34 = arith.constant 0.000000e+00 : f32
    %68 = vector.broadcast %cst_34 : f32 to vector<8x512xf32>
    %69 = arith.maximumf %67, %68 : vector<8x512xf32>
    %c17_i32_35 = arith.constant 17 : i32
    %70 = tpu.dynamic_rotate %69 by %c17_i32_35 dim 1 : vector<8x512xf32>, i32 -> vector<8x512xf32>
    %c0_36 = arith.constant 0 : index
    %c0_37 = arith.constant 0 : index
    %71 = vector.load %arg1[%c0_36, %c0_37] : memref<9x512xf32, #tpu.memory_space<vmem>>, vector<1x512xf32>
    %72 = vector.broadcast %71 : vector<1x512xf32> to vector<8x512xf32>
    %73 = arith.mulf %70, %72 : vector<8x512xf32>
    %c0_38 = arith.constant 0 : index
    %c0_39 = arith.constant 0 : index
    %74 = vector.load %arg10[%c0_38, %c0_39] : memref<72x512xf32, #tpu.memory_space<vmem>>, vector<8x512xf32>
    tpu.vector_store %arg10[%c0_38, %c0_39], %73 {strides = array<i32>} : memref<72x512xf32, #tpu.memory_space<vmem>>, vector<8x512xf32>,
    %c16_i32_40 = arith.constant 16 : i32
    %75 = tpu.dynamic_rotate %69 by %c16_i32_40 dim 1 : vector<8x512xf32>, i32 -> vector<8x512xf32>
    %c1_41 = arith.constant 1 : index
    %c0_42 = arith.constant 0 : index
    %76 = vector.load %arg1[%c1_41, %c0_42] : memref<9x512xf32, #tpu.memory_space<vmem>>, vector<1x512xf32>
    %77 = vector.broadcast %76 : vector<1x512xf32> to vector<8x512xf32>
    %78 = arith.mulf %75, %77 : vector<8x512xf32>
    %c8_43 = arith.constant 8 : index
    %c0_44 = arith.constant 0 : index
    %79 = vector.load %arg10[%c8_43, %c0_44] : memref<72x512xf32, #tpu.memory_space<vmem>>, vector<8x512xf32>
    tpu.vector_store %arg10[%c8_43, %c0_44], %78 {strides = array<i32>} : memref<72x512xf32, #tpu.memory_space<vmem>>, vector<8x512xf32>,
    %c15_i32_45 = arith.constant 15 : i32
    %80 = tpu.dynamic_rotate %69 by %c15_i32_45 dim 1 : vector<8x512xf32>, i32 -> vector<8x512xf32>
    %c2_46 = arith.constant 2 : index
    %c0_47 = arith.constant 0 : index
    %81 = vector.load %arg1[%c2_46, %c0_47] : memref<9x512xf32, #tpu.memory_space<vmem>>, vector<1x512xf32>
    %82 = vector.broadcast %81 : vector<1x512xf32> to vector<8x512xf32>
    %83 = arith.mulf %80, %82 : vector<8x512xf32>
    %c16_48 = arith.constant 16 : index
    %c0_49 = arith.constant 0 : index
    %84 = vector.load %arg10[%c16_48, %c0_49] : memref<72x512xf32, #tpu.memory_space<vmem>>, vector<8x512xf32>
    tpu.vector_store %arg10[%c16_48, %c0_49], %83 {strides = array<i32>} : memref<72x512xf32, #tpu.memory_space<vmem>>, vector<8x512xf32>,
    %c1_i32_50 = arith.constant 1 : i32
    %85 = tpu.dynamic_rotate %69 by %c1_i32_50 dim 1 : vector<8x512xf32>, i32 -> vector<8x512xf32>
    %c3_51 = arith.constant 3 : index
    %c0_52 = arith.constant 0 : index
    %86 = vector.load %arg1[%c3_51, %c0_52] : memref<9x512xf32, #tpu.memory_space<vmem>>, vector<1x512xf32>
    %87 = vector.broadcast %86 : vector<1x512xf32> to vector<8x512xf32>
    %88 = arith.mulf %85, %87 : vector<8x512xf32>
    %c24_53 = arith.constant 24 : index
    %c0_54 = arith.constant 0 : index
    %89 = vector.load %arg10[%c24_53, %c0_54] : memref<72x512xf32, #tpu.memory_space<vmem>>, vector<8x512xf32>
    tpu.vector_store %arg10[%c24_53, %c0_54], %88 {strides = array<i32>} : memref<72x512xf32, #tpu.memory_space<vmem>>, vector<8x512xf32>,
    %c32_55 = arith.constant 32 : index
    %c0_56 = arith.constant 0 : index
    %90 = vector.load %arg10[%c32_55, %c0_56] : memref<72x512xf32, #tpu.memory_space<vmem>>, vector<8x512xf32>
    tpu.vector_store %arg10[%c32_55, %c0_56], %69 {strides = array<i32>} : memref<72x512xf32, #tpu.memory_space<vmem>>, vector<8x512xf32>,
    %c511_i32_57 = arith.constant 511 : i32
    %91 = tpu.dynamic_rotate %69 by %c511_i32_57 dim 1 : vector<8x512xf32>, i32 -> vector<8x512xf32>
    %c5_58 = arith.constant 5 : index
    %c0_59 = arith.constant 0 : index
    %92 = vector.load %arg1[%c5_58, %c0_59] : memref<9x512xf32, #tpu.memory_space<vmem>>, vector<1x512xf32>
    %93 = vector.broadcast %92 : vector<1x512xf32> to vector<8x512xf32>
    %94 = arith.mulf %91, %93 : vector<8x512xf32>
    %c40_60 = arith.constant 40 : index
    %c0_61 = arith.constant 0 : index
    %95 = vector.load %arg10[%c40_60, %c0_61] : memref<72x512xf32, #tpu.memory_space<vmem>>, vector<8x512xf32>
    tpu.vector_store %arg10[%c40_60, %c0_61], %94 {strides = array<i32>} : memref<72x512xf32, #tpu.memory_space<vmem>>, vector<8x512xf32>,
    %c497_i32_62 = arith.constant 497 : i32
    %96 = tpu.dynamic_rotate %69 by %c497_i32_62 dim 1 : vector<8x512xf32>, i32 -> vector<8x512xf32>
    %c6_63 = arith.constant 6 : index
    %c0_64 = arith.constant 0 : index
    %97 = vector.load %arg1[%c6_63, %c0_64] : memref<9x512xf32, #tpu.memory_space<vmem>>, vector<1x512xf32>
    %98 = vector.broadcast %97 : vector<1x512xf32> to vector<8x512xf32>
    %99 = arith.mulf %96, %98 : vector<8x512xf32>
    %c48_65 = arith.constant 48 : index
    %c0_66 = arith.constant 0 : index
    %100 = vector.load %arg10[%c48_65, %c0_66] : memref<72x512xf32, #tpu.memory_space<vmem>>, vector<8x512xf32>
    tpu.vector_store %arg10[%c48_65, %c0_66], %99 {strides = array<i32>} : memref<72x512xf32, #tpu.memory_space<vmem>>, vector<8x512xf32>,
    %c496_i32_67 = arith.constant 496 : i32
    %101 = tpu.dynamic_rotate %69 by %c496_i32_67 dim 1 : vector<8x512xf32>, i32 -> vector<8x512xf32>
    %c7_68 = arith.constant 7 : index
    %c0_69 = arith.constant 0 : index
    %102 = vector.load %arg1[%c7_68, %c0_69] : memref<9x512xf32, #tpu.memory_space<vmem>>, vector<1x512xf32>
    %103 = vector.broadcast %102 : vector<1x512xf32> to vector<8x512xf32>
    %104 = arith.mulf %101, %103 : vector<8x512xf32>
    %c56_70 = arith.constant 56 : index
    %c0_71 = arith.constant 0 : index
    %105 = vector.load %arg10[%c56_70, %c0_71] : memref<72x512xf32, #tpu.memory_space<vmem>>, vector<8x512xf32>
    tpu.vector_store %arg10[%c56_70, %c0_71], %104 {strides = array<i32>} : memref<72x512xf32, #tpu.memory_space<vmem>>, vector<8x512xf32>,
    %c495_i32_72 = arith.constant 495 : i32
    %106 = tpu.dynamic_rotate %69 by %c495_i32_72 dim 1 : vector<8x512xf32>, i32 -> vector<8x512xf32>
    %c8_73 = arith.constant 8 : index
    %c0_74 = arith.constant 0 : index
    %107 = vector.load %arg1[%c8_73, %c0_74] : memref<9x512xf32, #tpu.memory_space<vmem>>, vector<1x512xf32>
    %108 = vector.broadcast %107 : vector<1x512xf32> to vector<8x512xf32>
    %109 = arith.mulf %106, %108 : vector<8x512xf32>
    %c64_75 = arith.constant 64 : index
    %c0_76 = arith.constant 0 : index
    %110 = vector.load %arg10[%c64_75, %c0_76] : memref<72x512xf32, #tpu.memory_space<vmem>>, vector<8x512xf32>
    tpu.vector_store %arg10[%c64_75, %c0_76], %109 {strides = array<i32>} : memref<72x512xf32, #tpu.memory_space<vmem>>, vector<8x512xf32>,
    %c0_77 = arith.constant 0 : index
    %c0_78 = arith.constant 0 : index
    %111 = vector.load %arg5[%c0_77, %c0_78] : memref<8x72xf32, #tpu.memory_space<vmem>>, vector<8x72xf32>
    %c0_79 = arith.constant 0 : index
    %c0_80 = arith.constant 0 : index
    %112 = vector.load %arg10[%c0_79, %c0_80] : memref<72x512xf32, #tpu.memory_space<vmem>>, vector<72x512xf32>
    %cst_81 = arith.constant dense<0.000000e+00> : vector<8x512xf32>
    %113 = tpu.matmul %111, %112, %cst_81 {dimension_numbers = #tpu.dot_dimension_numbers<[1], [0], [0], [1], [0, 0, 1, 1], [], []>} : vector<8x72xf32>, vector<72x512xf32>, vector<8x512xf32> -> vector<8x512xf32>
    %c0_82 = arith.constant 0 : index
    %c0_83 = arith.constant 0 : index
    %114 = vector.load %arg6[%c0_82, %c0_83] : memref<8x1xf32, #tpu.memory_space<vmem>>, vector<8x1xf32>
    %c0_84 = arith.constant 0 : index
    %c0_85 = arith.constant 0 : index
    %115 = vector.load %arg7[%c0_84, %c0_85] : memref<8x1xf32, #tpu.memory_space<vmem>>, vector<8x1xf32>
    %cst_86 = arith.constant dense<0.000000e+00> : vector<8xf32>
    %116 = vector.multi_reduction <add>, %113, %cst_86 [1] : vector<8x512xf32> to vector<8xf32>
    %117 = vector.shape_cast %116 : vector<8xf32> to vector<8x1xf32>
    %118 = arith.mulf %113, %113 : vector<8x512xf32>
    %cst_87 = arith.constant dense<0.000000e+00> : vector<8xf32>
    %119 = vector.multi_reduction <add>, %118, %cst_87 [1] : vector<8x512xf32> to vector<8xf32>
    %120 = vector.shape_cast %119 : vector<8xf32> to vector<8x1xf32>
    %cst_88 = arith.constant 0.001953125 : f32
    %121 = vector.broadcast %cst_88 : f32 to vector<8x1xf32>
    %122 = arith.mulf %117, %121 : vector<8x1xf32>
    %cst_89 = arith.constant 0.001953125 : f32
    %123 = vector.broadcast %cst_89 : f32 to vector<8x1xf32>
    %124 = arith.mulf %120, %123 : vector<8x1xf32>
    %125 = arith.mulf %122, %122 : vector<8x1xf32>
    %126 = arith.subf %124, %125 : vector<8x1xf32>
    %cst_90 = arith.constant 9.99999974E-6 : f32
    %127 = vector.broadcast %cst_90 : f32 to vector<8x1xf32>
    %128 = arith.addf %126, %127 : vector<8x1xf32>
    %129 = math.rsqrt %128 : vector<8x1xf32>
    %130 = arith.mulf %114, %129 : vector<8x1xf32>
    %131 = arith.mulf %122, %130 : vector<8x1xf32>
    %132 = arith.subf %115, %131 : vector<8x1xf32>
    %133 = vector.broadcast %130 : vector<8x1xf32> to vector<8x512xf32>
    %134 = arith.mulf %113, %133 : vector<8x512xf32>
    %135 = vector.broadcast %132 : vector<8x1xf32> to vector<8x512xf32>
    %136 = arith.addf %134, %135 : vector<8x512xf32>
    %cst_91 = arith.constant 0.000000e+00 : f32
    %137 = vector.broadcast %cst_91 : f32 to vector<8x512xf32>
    %138 = arith.maximumf %136, %137 : vector<8x512xf32>
    %c511_i32_92 = arith.constant 511 : i32
    %139 = tpu.dynamic_rotate %138 by %c511_i32_92 dim 1 : vector<8x512xf32>, i32 -> vector<8x512xf32>
    %140 = arith.maximumf %138, %139 : vector<8x512xf32>
    %c496_i32_93 = arith.constant 496 : i32
    %141 = tpu.dynamic_rotate %140 by %c496_i32_93 dim 1 : vector<8x512xf32>, i32 -> vector<8x512xf32>
    %142 = arith.maximumf %140, %141 : vector<8x512xf32>
    %c0_94 = arith.constant 0 : index
    %c0_95 = arith.constant 0 : index
    %143 = vector.load %arg8[%c0_94, %c0_95] : memref<512x128xf32, #tpu.memory_space<vmem>>, vector<512x128xf32>
    %cst_96 = arith.constant dense<0.000000e+00> : vector<8x128xf32>
    %144 = tpu.matmul %142, %143, %cst_96 {dimension_numbers = #tpu.dot_dimension_numbers<[1], [0], [0], [1], [0, 0, 1, 1], [], []>} : vector<8x512xf32>, vector<512x128xf32>, vector<8x128xf32> -> vector<8x128xf32>
    %c0_97 = arith.constant 0 : index
    %c0_98 = arith.constant 0 : index
    %145 = vector.load %arg9[%c0_97, %c0_98] : memref<8x128xf32, #tpu.memory_space<vmem>>, vector<8x128xf32>
    tpu.vector_store %arg9[%c0_97, %c0_98], %144 {strides = array<i32>} : memref<8x128xf32, #tpu.memory_space<vmem>>, vector<8x128xf32>,
    return
  }
}

</mosaic_0001>

<bundles_post_ra>
// kernel: tpu_custom_call.1
= control target key start
LH: loop header
LB: loop body
LE: loop exit
PB: predicated region body
PF: predicated region fallthrough
CT: control target
= control target key end

     0   :  { %14 = vsyncpa [#allocation4], 0  ;;  %s2264_s0 = inlined_call_operand.vmem [shape: f32[8,512], index: 0, kind: input, shape index: {}]   ;;  %s2265_s1 = inlined_call_operand.hbm [shape: f32[9,512], index: 1, kind: input, shape index: {}]   ;;  %s2266_s2 = inlined_call_operand.hbm [shape: f32[8,72], index: 2, kind: input, shape index: {}]   ;;  %s2267_s3 = inlined_call_operand.vmem [shape: f32[8,1], index: 3, kind: input, shape index: {}]   ;;  %s2268_s4 = inlined_call_operand.vmem [shape: f32[8,1], index: 4, kind: input, shape index: {}]   ;;  %s2269_s5 = inlined_call_operand.vmem [shape: f32[8,72], index: 5, kind: input, shape index: {}]   ;;  %s2270_s6 = inlined_call_operand.vmem [shape: f32[8,1], index: 6, kind: input, shape index: {}]   ;;  %s2271_s7 = inlined_call_operand.vmem [shape: f32[8,1], index: 7, kind: input, shape index: {}]   ;;  %s2272_s8 = inlined_call_operand.hbm [shape: f32[512,128], index: 8, kind: input, shape index: {}]   ;;  %s2273_s9 = inlined_call_operand.hbm [shape: f32[8,128], index: 9, kind: output, shape index: {}]  }
   0x1   :  { %15 = vsyncpa [#allocation7], 0 }
   0x2   :  { %16 = vsyncpa [#allocation5], 0  ;;  %s1689_s30 = smov [#allocation6]   ;;  %s1690_s11 = smov [#allocation3]  }
   0x3   :  { %s37_s10 = sshll.u32 %s1689_s30, 4  ;;  %s24_s12 = sshll.u32 %s1690_s11, 4  ;;  %s38_s10 = int_to_ptr.vmem [resolvable:$true] %s37_s10  ;;  %s25_s12 = int_to_ptr.vmem [resolvable:$true] %s24_s12 }
   0x4   :  { %s1611_s13 = scalar_lea.vmem %s38_s10, 128  ;;  %p1616_p1 = scmp.lt.s32.totalorder %s38_s10, %s38_s10 }
   0x5   :  { %p1612_p0 = scmp.ne.s32.totalorder %s38_s10, %s1611_s13  ;;  %p1617_p2 = scmp.lt.s32.totalorder %s1611_s13, %s1611_s13 }
   0x7   :  { %p1618_p3 = por %p1617_p2, %p1616_p1 }
   0x9   :  { %p1619_p4 = pnand %p1618_p3, %p1612_p0 }
   0xb   :  { %1622 = shalt.err (!%p1619_p4)
}
   0xc   :  { %40 = dma.hbm_to_vmem [thread:$0]  %s2266_s2, 128, %s38_s10, [#allocation7]  }
   0xd   :  { %s1631_s16 = scalar_lea.vmem %s25_s12, 1024  ;;  %p1636_p6 = scmp.lt.s32.totalorder %s25_s12, %s25_s12 }
   0xe   :  { %p1632_p5 = scmp.ne.s32.totalorder %s25_s12, %s1631_s16  ;;  %p1637_p7 = scmp.lt.s32.totalorder %s1631_s16, %s1631_s16 }
  0x10   :  { %p1638_p8 = por %p1637_p7, %p1636_p6 }
  0x12   :  { %p1639_p9 = pnand %p1638_p8, %p1632_p5 }
  0x14   :  { %1642 = shalt.err (!%p1639_p9)
}
  0x15   :  { %s1691_s17 = smov 512   ;;  %s1692_s18 = smov 32  }
  0x16   :  { %30 = dma.hbm_to_vmem [thread:$0]  %s2265_s1, 1024, %s25_s12, [#allocation4], %s1691_s17, %s1691_s17, %s1692_s18  }
  0x17   :  { %s1693_s21 = smov [#allocation8]  }
  0x18   :  { %s56_s22 = sshll.u32 %s1693_s21, 4  ;;  %s57_s22 = int_to_ptr.vmem [resolvable:$true] %s56_s22 }
  0x19   :  { %s1651_s23 = scalar_lea.vmem %s57_s22, 8192  ;;  %p1656_p11 = scmp.lt.s32.totalorder %s57_s22, %s57_s22 }
  0x1a   :  { %p1652_p10 = scmp.ne.s32.totalorder %s57_s22, %s1651_s23  ;;  %p1657_p12 = scmp.lt.s32.totalorder %s1651_s23, %s1651_s23 }
  0x1c   :  { %p1658_p13 = por %p1657_p12, %p1656_p11 }
  0x1e   :  { %p1659_p0 = pnand %p1658_p13, %p1652_p10 }
  0x20   :  { %1662 = shalt.err (!%p1659_p0)
}
  0x21   :  { %s1694_s2 = smov 128   ;;  %s1695_s24 = smov 8  }
  0x22   :  { %62 = dma.hbm_to_vmem [thread:$0]  %s2272_s8, 8192, %s57_s22, [#allocation7], %s1694_s2, %s1694_s2, %s1695_s24  }
  0x23   :  { %1683 = dma.done.wait [#allocation4], 1024  }
  0x24   :  { %1684 = vsyncadd [#allocation4], 4294966272 }
  0x25   :  { %1685 = dma.done.wait [#allocation7], 8320  }
  0x26   :  { %1686 = vsyncadd [#allocation7], 4294958976  ;;  %v1769_v0 = vld [vmem:[%s2264_s0 + $0x8] sm:$0xff]  ;;  %v1774_v1 = vld [vmem:[%s2264_s0] sm:$0xff]  ;;  %s1696_s30 = smov 111   ;;  %s1697_s11 = smov 112   ;;  %v84_v5 = vlaneseq }
  0x27   :  { %391 = vrot.lane.b32.xlu0 %v1769_v0, %s1696_s30  ;;  %389 = vrot.lane.b32.xlu1 %v1774_v1, %s1696_s30  ;;  %v1783_v2 = vld [vmem:[%s2264_s0 + $0x10] sm:$0xff]  ;;  %s1698_s12 = smov 113   ;;  %v1800_v3 = vld [vmem:[%s2264_s0 + $0x18] sm:$0xff]  ;;  %s1699_s15 = smov 127   ;;  %v1703_v4 = vmov 0.0   ;;  %vm470_vm8 = vcmask 588800  }
  0x28   :  { %s1700_s0 = smov 1   ;;  %s1701_s16 = smov 15   ;;  %538 = vmatprep.mubr.f32.mxu0 %v1703_v4  ;;  %609 = vmatprep.mubr.f32.mxu1 %v1703_v4  ;;  %v94_v6 = vshrl.u32 %v84_v5, 7  ;;  %v1852_v7 = vand.u32 127, %v84_v5 }
  0x29   :  { %s1702_s17 = smov 16   ;;  %s1704_s18 = smov 17   ;;  %v403_v12 = vld [vmem:[#allocation3 + $0x20] ss:$8 sm:$0xf] }
  0x2a   :  { %v1854_v8 = vsub.s32 1, %v94_v6  ;;  %v1856_v9 = vsub.s32 0, %v94_v6  ;;  %vm397_vm0 = vcmp.lt.s32.totalorder %v1852_v7, 111  ;;  %v1860_v14 = vld [vmem:[#allocation3 + $0x7] ss:$8 sm:$0xf] }
  0x2b   :  { %393 = vrot.lane.b32.xlu0 %v1783_v2, %s1696_s30  ;;  %347 = vrot.lane.b32.xlu1 %v1769_v0, %s1697_s11  ;;  %vm353_vm1 = vcmp.lt.s32.totalorder %v1852_v7, 112  ;;  %v1872_v24 = vld [vmem:[#allocation3 + $0x6] ss:$8 sm:$0xf]  ;;  %v1874_v27 = vsub.s32 2, %v94_v6  ;;  %v1876_v28 = vsub.s32 3, %v94_v6 }
  0x2c   :  { %v412_v13 = vrot.slane %v403_v12, %v1854_v8  ;;  %v408_v15 = vrot.slane %v403_v12, %v1856_v9  ;;  %v368_v21 = vrot.slane %v1860_v14, %v1854_v8  ;;  %v364_v22 = vrot.slane %v1860_v14, %v1856_v9  ;;  %v271_v41 = vld [vmem:[#allocation3 + $0x5] ss:$8 sm:$0xf] }
  0x2d   :  { %vm309_vm2 = vcmp.lt.s32.totalorder %v1852_v7, 113  ;;  %v324_v33 = vrot.slane %v1872_v24, %v1854_v8  ;;  %v320_v38 = vrot.slane %v1872_v24, %v1856_v9  ;;  %v420_v39 = vrot.slane %v403_v12, %v1876_v28 }
  0x2e   :  { %v416_v40 = vrot.slane %v403_v12, %v1874_v27  ;;  %vm265_vm3 = vcmp.lt.s32.totalorder %v1852_v7, 127  ;;  %v280_v49 = vrot.slane %v271_v41, %v1854_v8  ;;  %v372_v55 = vrot.slane %v1860_v14, %v1874_v27  ;;  %v1916_v12 = vld [vmem:[#allocation3 + $0x3] ss:$8 sm:$0xf] }
  0x2f   :  { %349 = vrot.lane.b32.xlu0 %v1783_v2, %s1697_s11  ;;  %345 = vrot.lane.b32.xlu1 %v1774_v1, %s1697_s11  ;;  %v376_v56 = vrot.slane %v1860_v14, %v1876_v28  ;;  %v276_v57 = vrot.slane %v271_v41, %v1856_v9  ;;  %v328_v63 = vrot.slane %v1872_v24, %v1874_v27  ;;  %vm217_vm4 = vcmp.lt.s32.totalorder %v1852_v7, 1 }
  0x30   :  { %vm173_vm5 = vcmp.lt.s32.totalorder %v1852_v7, 15  ;;  %vm129_vm6 = vcmp.lt.s32.totalorder %v1852_v7, 16  ;;  %vm86_vm7 = vcmp.lt.s32.totalorder %v1852_v7, 17 }
  0x33   :  { %303 = vrot.lane.b32.xlu0 %v1769_v0, %s1698_s12  ;;  %305 = vrot.lane.b32.xlu1 %v1783_v2, %s1698_s12 }
  0x37   :  { %395 = vrot.lane.b32.xlu0 %v1800_v3, %s1696_s30  ;;  %301 = vrot.lane.b32.xlu1 %v1774_v1, %s1698_s12 }
  0x3b   :  { %259 = vrot.lane.b32.xlu0 %v1769_v0, %s1699_s15  ;;  %261 = vrot.lane.b32.xlu1 %v1783_v2, %s1699_s15 }
  0x3f   :  { %351 = vrot.lane.b32.xlu0 %v1800_v3, %s1697_s11  ;;  %257 = vrot.lane.b32.xlu1 %v1774_v1, %s1699_s15 }
  0x43   :  { %307 = vrot.lane.b32.xlu0 %v1800_v3, %s1698_s12  ;;  %209 = vrot.lane.b32.xlu1 %v1774_v1, %s1700_s0 }
  0x47   :  { %211 = vrot.lane.b32.xlu0 %v1769_v0, %s1700_s0  ;;  %263 = vrot.lane.b32.xlu1 %v1800_v3, %s1699_s15 }
  0x4b   :  { %215 = vrot.lane.b32.xlu0 %v1800_v3, %s1700_s0  ;;  %165 = vrot.lane.b32.xlu1 %v1774_v1, %s1701_s16 }
  0x4f   :  { %167 = vrot.lane.b32.xlu0 %v1769_v0, %s1701_s16  ;;  %171 = vrot.lane.b32.xlu1 %v1800_v3, %s1701_s16 }
  0x53   :  { %121 = vrot.lane.b32.xlu0 %v1774_v1, %s1702_s17  ;;  %123 = vrot.lane.b32.xlu1 %v1769_v0, %s1702_s17 }
  0x57   :  { %213 = vrot.lane.b32.xlu0 %v1783_v2, %s1700_s0  ;;  %127 = vrot.lane.b32.xlu1 %v1800_v3, %s1702_s17 }
  0x5b   :  { %76 = vrot.lane.b32.xlu0 %v1774_v1, %s1704_s18  ;;  %78 = vrot.lane.b32.xlu1 %v1769_v0, %s1704_s18 }
  0x5f   :  { %169 = vrot.lane.b32.xlu0 %v1783_v2, %s1701_s16  ;;  %82 = vrot.lane.b32.xlu1 %v1800_v3, %s1704_s18 }
  0x63   :  { %125 = vrot.lane.b32.xlu0 %v1783_v2, %s1702_s17  ;;  %80 = vrot.lane.b32.xlu1 %v1783_v2, %s1704_s18 }
  0x99   :  { %v392_v10 = vpop.permute.xlu0 %391  ;;  %v390_v11 = vpop.permute.xlu1 %389 }
  0x9a   :  { %v400_v16 = vsel %vm397_vm0, %v390_v11, %v392_v10 }
  0x9b   :  { %v425_v23 = vmul.f32 %v408_v15, %v400_v16 }
  0x9d   :  { %v394_v17 = vpop.permute.xlu0 %393  ;;  %v348_v18 = vpop.permute.xlu1 %347 }
  0x9e   :  { %v399_v19 = vsel %vm397_vm0, %v392_v10, %v394_v17 }
  0x9f   :  { %v426_v20 = vmul.f32 %v412_v13, %v399_v19 }
  0xa1   :  { %488 = vmatprep.subr.mxu0 %v426_v20  ;;  %v350_v25 = vpop.permute.xlu0 %349  ;;  %v346_v26 = vpop.permute.xlu1 %345  ;;  %v284_v20 = vrot.slane %v271_v41, %v1874_v27 }
  0xa2   :  { %v355_v29 = vsel %vm353_vm1, %v348_v18, %v350_v25  ;;  %v356_v30 = vsel %vm353_vm1, %v346_v26, %v348_v18  ;;  %489 = vmatpush1.msra.mxu0 %v425_v23 }
  0xa3   :  { %v382_v31 = vmul.f32 %v368_v21, %v355_v29  ;;  %v381_v32 = vmul.f32 %v364_v22, %v356_v30  ;;  %v288_v21 = vrot.slane %v271_v41, %v1876_v28 }
  0xa5   :  { %v304_v34 = vpop.permute.xlu0 %303  ;;  %490 = vmatprep.subr.mxu0 %v382_v31  ;;  %v306_v35 = vpop.permute.xlu1 %305  ;;  %v228_v31 = vrot.slane %v1916_v12, %v1856_v9 }
  0xa6   :  { %v311_v36 = vsel %vm309_vm2, %v304_v34, %v306_v35  ;;  %491 = vmatpush1.msra.mxu0 %v381_v32 }
  0xa7   :  { %v338_v37 = vmul.f32 %v324_v33, %v311_v36 }
  0xa9   :  { %v396_v42 = vpop.permute.xlu0 %395  ;;  %492 = vmatprep.subr.mxu0 %v338_v37  ;;  %v302_v43 = vpop.permute.xlu1 %301 }
  0xaa   :  { %v398_v44 = vsel %vm397_vm0, %v394_v17, %v396_v42  ;;  %v312_v45 = vsel %vm309_vm2, %v302_v43, %v304_v34  ;;  %v401_v46 = vsel %vm397_vm0, %v396_v42, %v390_v11  ;;  %v332_v11 = vrot.slane %v1872_v24, %v1876_v28 }
  0xab   :  { %v337_v47 = vmul.f32 %v320_v38, %v312_v45  ;;  %v428_v48 = vmul.f32 %v420_v39, %v401_v46  ;;  %v427_v50 = vmul.f32 %v416_v40, %v398_v44  ;;  %v232_v17 = vrot.slane %v1916_v12, %v1854_v8  ;;  %v1947_v38 = vld [vmem:[#allocation3 + $0x1] ss:$8 sm:$0xf] }
  0xad   :  { %v260_v51 = vpop.permute.xlu0 %259  ;;  %493 = vmatpush1.msra.mxu0 %v337_v47  ;;  %559 = vmatprep.subr.mxu1 %v428_v48  ;;  %v262_v52 = vpop.permute.xlu1 %261  ;;  %v236_v48 = vrot.slane %v1916_v12, %v1874_v27 }
  0xae   :  { %v267_v53 = vsel %vm265_vm3, %v260_v51, %v262_v52  ;;  %560 = vmatpush1.msra.mxu1 %v427_v50  ;;  %v140_v50 = vrot.slane %v1947_v38, %v1856_v9 }
  0xaf   :  { %v294_v54 = vmul.f32 %v280_v49, %v267_v53  ;;  %v240_v49 = vrot.slane %v1916_v12, %v1876_v28 }
  0xb1   :  { %v352_v58 = vpop.permute.xlu0 %351  ;;  %494 = vmatprep.subr.mxu0 %v294_v54  ;;  %v258_v59 = vpop.permute.xlu1 %257 }
  0xb2   :  { %v354_v60 = vsel %vm353_vm1, %v350_v25, %v352_v58  ;;  %v357_v61 = vsel %vm353_vm1, %v352_v58, %v346_v26  ;;  %v268_v62 = vsel %vm265_vm3, %v258_v59, %v260_v51  ;;  %v91_v51 = vld [vmem:[#allocation3] ss:$8 sm:$0xf] }
  0xb3   :  { %v383_v5 = vmul.f32 %v372_v55, %v354_v60  ;;  %v384_v6 = vmul.f32 %v376_v56, %v357_v61  ;;  %v293_v10 = vmul.f32 %v276_v57, %v268_v62  ;;  %v100_v60 = vrot.slane %v91_v51, %v1854_v8 }
  0xb5   :  { %v308_v13 = vpop.permute.xlu0 %307  ;;  %495 = vmatpush1.msra.mxu0 %v293_v10  ;;  %561 = vmatprep.subr.mxu1 %v384_v6  ;;  %v210_v14 = vpop.permute.xlu1 %209 }
  0xb6   :  { %v310_v15 = vsel %vm309_vm2, %v306_v35, %v308_v13  ;;  %v313_v16 = vsel %vm309_vm2, %v308_v13, %v302_v43  ;;  %562 = vmatpush1.msra.mxu1 %v383_v5  ;;  %496 = vmatprep.subr.mxu0 %v1769_v0 }
  0xb7   :  { %v339_v18 = vmul.f32 %v328_v63, %v310_v15  ;;  %v340_v19 = vmul.f32 %v332_v11, %v313_v16  ;;  %497 = vmatpush1.msra.mxu0 %v1774_v1  ;;  %v1937_v1 = vld [vmem:[#allocation3 + $0x2] ss:$8 sm:$0xf]  ;;  %v96_v11 = vrot.slane %v91_v51, %v1856_v9 }
  0xb8   :  { %v188_v36 = vrot.slane %v1937_v1, %v1854_v8  ;;  %v184_v37 = vrot.slane %v1937_v1, %v1856_v9  ;;  %v192_v6 = vrot.slane %v1937_v1, %v1874_v27  ;;  %v196_v10 = vrot.slane %v1937_v1, %v1876_v28 }
  0xb9   :  { %v212_v22 = vpop.permute.xlu0 %211  ;;  %563 = vmatprep.subr.mxu1 %v340_v19  ;;  %v264_v23 = vpop.permute.xlu1 %263 }
  0xba   :  { %v220_v24 = vsel %vm217_vm4, %v210_v14, %v212_v22  ;;  %v266_v25 = vsel %vm265_vm3, %v262_v52, %v264_v23  ;;  %v269_v0 = vsel %vm265_vm3, %v264_v23, %v258_v59  ;;  %564 = vmatpush1.msra.mxu1 %v339_v18 }
  0xbb   :  { %v246_v26 = vmul.f32 %v232_v17, %v220_v24  ;;  %v295_v29 = vmul.f32 %v284_v20, %v266_v25  ;;  %v296_v30 = vmul.f32 %v288_v21, %v269_v0  ;;  %v148_v17 = vrot.slane %v1947_v38, %v1874_v27 }
  0xbc   :  { %v152_v21 = vrot.slane %v1947_v38, %v1876_v28  ;;  %v108_v24 = vrot.slane %v91_v51, %v1876_v28 }
  0xbd   :  { %v216_v32 = vpop.permute.xlu0 %215  ;;  %498 = vmatprep.subr.mxu0 %v246_v26  ;;  %565 = vmatprep.subr.mxu1 %v296_v30  ;;  %v166_v33 = vpop.permute.xlu1 %165 }
  0xbe   :  { %v221_v34 = vsel %vm217_vm4, %v216_v32, %v210_v14  ;;  %566 = vmatpush1.msra.mxu1 %v295_v29  ;;  %v104_v29 = vrot.slane %v91_v51, %v1874_v27 }
  0xbf   :  { %v245_v35 = vmul.f32 %v228_v31, %v221_v34  ;;  %567 = vmatprep.subr.mxu1 %v1800_v3  ;;  %v144_v3 = vrot.slane %v1947_v38, %v1854_v8 }
  0xc0   :  { %568 = vmatpush1.msra.mxu1 %v1783_v2 }
  0xc1   :  { %v168_v39 = vpop.permute.xlu0 %167  ;;  %499 = vmatpush1.msra.mxu0 %v245_v35  ;;  %v172_v40 = vpop.permute.xlu1 %171 }
  0xc2   :  { %v176_v41 = vsel %vm173_vm5, %v166_v33, %v168_v39  ;;  %v177_v42 = vsel %vm173_vm5, %v172_v40, %v166_v33 }
  0xc3   :  { %v202_v43 = vmul.f32 %v188_v36, %v176_v41  ;;  %v201_v44 = vmul.f32 %v184_v37, %v177_v42 }
  0xc5   :  { %v122_v45 = vpop.permute.xlu0 %121  ;;  %500 = vmatprep.subr.mxu0 %v202_v43  ;;  %v124_v46 = vpop.permute.xlu1 %123 }
  0xc6   :  { %v132_v2 = vsel %vm129_vm6, %v122_v45, %v124_v46  ;;  %501 = vmatpush1.msra.mxu0 %v201_v44 }
  0xc7   :  { %v158_v47 = vmul.f32 %v144_v3, %v132_v2 }
  0xc9   :  { %v214_v52 = vpop.permute.xlu0 %213  ;;  %502 = vmatprep.subr.mxu0 %v158_v47  ;;  %v128_v53 = vpop.permute.xlu1 %127  ;;  %v1705_v47 = vmov 0  }
  0xca   :  { %v218_v54 = vsel %vm217_vm4, %v214_v52, %v216_v32  ;;  %v219_v55 = vsel %vm217_vm4, %v212_v22, %v214_v52  ;;  %v133_v56 = vsel %vm129_vm6, %v128_v53, %v122_v45  ;;  %v433_v22 = vld [vmem:[#allocation6] sm:$0xff]  ;;  %1577 = vset.pattern.permute.xlu0 %v1705_v47  ;;  %1578 = vset.pattern.permute.xlu1 %v1705_v47 }
  0xcb   :  { %v247_v57 = vmul.f32 %v236_v48, %v219_v55  ;;  %v248_v58 = vmul.f32 %v240_v49, %v218_v54  ;;  %v157_v59 = vmul.f32 %v140_v50, %v133_v56  ;;  %v616_v54 = vld [vmem:[%s2267_s3] sm:$0xff] }
  0xcd   :  { %v77_v61 = vpop.permute.xlu0 %76  ;;  %503 = vmatpush1.msra.mxu0 %v157_v59  ;;  %569 = vmatprep.subr.mxu1 %v248_v58  ;;  %v79_v62 = vpop.permute.xlu1 %78 }
  0xce   :  { %v89_v63 = vsel %vm86_vm7, %v77_v61, %v79_v62  ;;  %570 = vmatpush1.msra.mxu1 %v247_v57  ;;  %v617_v57 = vld [vmem:[%s2268_s4] sm:$0xff] }
  0xcf   :  { %v114_v5 = vmul.f32 %v100_v60, %v89_v63 }
  0xd1   :  { %v170_v12 = vpop.permute.xlu0 %169  ;;  %504 = vmatprep.subr.mxu0 %v114_v5  ;;  %v83_v13 = vpop.permute.xlu1 %82 }
  0xd2   :  { %v174_v14 = vsel %vm173_vm5, %v170_v12, %v172_v40  ;;  %v175_v15 = vsel %vm173_vm5, %v168_v39, %v170_v12  ;;  %v90_v16 = vsel %vm86_vm7, %v83_v13, %v77_v61 }
  0xd3   :  { %v203_v18 = vmul.f32 %v192_v6, %v175_v15  ;;  %v204_v19 = vmul.f32 %v196_v10, %v174_v14  ;;  %v113_v20 = vmul.f32 %v96_v11, %v90_v16 }
  0xd5   :  { %v126_v23 = vpop.permute.xlu0 %125  ;;  %505 = vmatpush1.msra.mxu0 %v113_v20  ;;  %571 = vmatprep.subr.mxu1 %v204_v19  ;;  %v81_v25 = vpop.permute.xlu1 %80 }
  0xd6   :  { %v130_v0 = vsel %vm129_vm6, %v126_v23, %v128_v53  ;;  %v131_v26 = vsel %vm129_vm6, %v124_v46, %v126_v23  ;;  %v87_v30 = vsel %vm86_vm7, %v81_v25, %v83_v13  ;;  %572 = vmatpush1.msra.mxu1 %v203_v18  ;;  %v88_v32 = vsel %vm86_vm7, %v79_v62, %v81_v25  ;;  %v973_v18 = vld [vmem:[#allocation3 + $0x20] ss:$8 sm:$0xf] }
  0xd7   :  { %v159_v31 = vmul.f32 %v148_v17, %v131_v26  ;;  %v160_v1 = vmul.f32 %v152_v21, %v130_v0  ;;  %1485 = vmatmul.mubr.msk.f32.vlgmr.msra.gmra.mxu0 %vm470_vm8, %v433_v22  ;;  %v116_v33 = vmul.f32 %v108_v24, %v87_v30  ;;  %v115_v34 = vmul.f32 %v104_v29, %v88_v32 }
  0xd8   :  { %1107 = vmatprep.mubr.f32.mxu0 %v1703_v4  ;;  %v982_v21 = vrot.slane %v973_v18, %v1854_v8  ;;  %v978_v0 = vrot.slane %v973_v18, %v1856_v9  ;;  %v990_v26 = vrot.slane %v973_v18, %v1876_v28  ;;  %v986_v29 = vrot.slane %v973_v18, %v1874_v27 }
  0xd9   :  { %573 = vmatprep.subr.mxu1 %v160_v1 }
  0xda   :  { %574 = vmatpush1.msra.mxu1 %v159_v31 }
  0xdb   :  { %575 = vmatprep.subr.mxu1 %v116_v33 }
  0xdc   :  { %576 = vmatpush1.msra.mxu1 %v115_v34 }
  0xdd   :  { %1486 = vmatmul.mubr.msk.f32.vlgmr.msra.gmra.mxu1 %vm470_vm8, %v433_v22 }
  0xde   :  { %1178 = vmatprep.mubr.f32.mxu1 %v1703_v4 }
 0x197   :  { %v540_v35 = vpop.f32.mrf.mxu0 }
 0x198   :  { %v623_v37 = vmul.f32 %v540_v35, %v540_v35 }
 0x199   :  { %v542_v36 = vpop.f32.mrf.mxu0 }
 0x19a   :  { %v624_v38 = vmul.f32 %v542_v36, %v542_v36  ;;  %v618_v39 = vadd.f32 %v542_v36, %v540_v35 }
 0x19c   :  { %v627_v43 = vadd.f32 %v624_v38, %v623_v37  ;;  %v931_v37 = vld [vmem:[#allocation3 + $0x7] ss:$8 sm:$0xf] }
 0x19d   :  { %v611_v40 = vpop.f32.mrf.mxu1 }
 0x19e   :  { %v625_v41 = vmul.f32 %v611_v40, %v611_v40  ;;  %v619_v42 = vadd.f32 %v618_v39, %v611_v40 }
 0x19f   :  { %v613_v44 = vpop.f32.mrf.mxu1 }
 0x1a0   :  { %v620_v3 = vadd.f32 %v619_v42, %v613_v44  ;;  %v626_v45 = vmul.f32 %v613_v44, %v613_v44  ;;  %v628_v46 = vadd.f32 %v627_v43, %v625_v41 }
 0x1a2   :  { %621 = vadd.xlane.f32.xlu0 %v620_v3  ;;  %v629_v2 = vadd.f32 %v628_v46, %v626_v45  ;;  %v936_v3 = vrot.slane %v931_v37, %v1856_v9  ;;  %v948_v45 = vrot.slane %v931_v37, %v1876_v28  ;;  %v944_v46 = vrot.slane %v931_v37, %v1874_v27 }
 0x1a4   :  { %630 = vadd.xlane.f32.xlu1 %v629_v2  ;;  %v889_v2 = vld [vmem:[#allocation3 + $0x6] ss:$8 sm:$0xf] }
 0x22b   :  { %v622_v4 = vpop.xlane.xlu0 %621 }
 0x22c   :  { %v632_v48 = vmul.f32 0.001953125, %v622_v4 }
 0x22d   :  { %v631_v49 = vpop.xlane.xlu1 %630 }
 0x22e   :  { %v634_v50 = vmul.f32 %v632_v48, %v632_v48  ;;  %v633_v51 = vmul.f32 0.001953125, %v631_v49 }
 0x230   :  { %v635_v52 = vsub.f32 %v633_v51, %v634_v50 }
 0x232   :  { %v636_v53 = vadd.f32 1e-05, %v635_v52 }
 0x234   :  { %1599 = vrsqrt.f32 %v636_v53  ;;  %v898_v53 = vrot.slane %v889_v2, %v1854_v8 }
 0x241   :  { %v1600_v55 = vpop.eup %1599 }
 0x242   :  { %v638_v56 = vmul.f32 %v1600_v55, %v616_v54 }
 0x244   :  { %643 = vperm.xlu0 %1577, %v638_v56   ;;  %v639_v58 = vmul.f32 %v638_v56, %v632_v48 }
 0x246   :  { %v640_v59 = vsub.f32 %v617_v57, %v639_v58 }
 0x248   :  { %652 = vperm.xlu1 %1578, %v640_v59   ;;  %v894_v59 = vrot.slane %v889_v2, %v1856_v9 }
 0x2bf   :  { %v644_v60 = vpop.permute.xlu0 %643 }
 0x2c0   :  { %v647_v61 = vmul.f32 %v644_v60, %v542_v36  ;;  %v648_v63 = vmul.f32 %v644_v60, %v611_v40  ;;  %v649_v5 = vmul.f32 %v644_v60, %v613_v44  ;;  %v646_v13 = vmul.f32 %v644_v60, %v540_v35 }
 0x2c1   :  { %v940_v40 = vrot.slane %v931_v37, %v1854_v8  ;;  %v906_v60 = vrot.slane %v889_v2, %v1876_v28 }
 0x2c3   :  { %v653_v62 = vpop.permute.xlu1 %652 }
 0x2c4   :  { %v656_v6 = vadd.f32 %v653_v62, %v647_v61  ;;  %v657_v10 = vadd.f32 %v653_v62, %v648_v63  ;;  %v658_v11 = vadd.f32 %v653_v62, %v649_v5  ;;  %v655_v14 = vadd.f32 %v653_v62, %v646_v13  ;;  %v847_v62 = vld [vmem:[#allocation3 + $0x5] ss:$8 sm:$0xf] }
 0x2c5   :  { %v902_v61 = vrot.slane %v889_v2, %v1874_v27  ;;  %v856_v18 = vrot.slane %v847_v62, %v1854_v8 }
 0x2c6   :  { %v2010_v12 = vmax.f32 %v656_v6, 0.0  ;;  %v2016_v15 = vmax.f32 %v657_v10, 0.0  ;;  %v2018_v16 = vmax.f32 %v658_v11, 0.0  ;;  %v2024_v17 = vmax.f32 %v655_v14, 0.0 }
 0x2c8   :  { %879 = vrot.lane.b32.xlu0 %v2010_v12, %s1698_s12  ;;  %963 = vrot.lane.b32.xlu1 %v2010_v12, %s1696_s30 }
 0x2cc   :  { %967 = vrot.lane.b32.xlu0 %v2018_v16, %s1696_s30  ;;  %965 = vrot.lane.b32.xlu1 %v2016_v15, %s1696_s30 }
 0x2d0   :  { %837 = vrot.lane.b32.xlu0 %v2010_v12, %s1699_s15  ;;  %961 = vrot.lane.b32.xlu1 %v2024_v17, %s1696_s30 }
 0x2d4   :  { %925 = vrot.lane.b32.xlu0 %v2018_v16, %s1697_s11  ;;  %921 = vrot.lane.b32.xlu1 %v2010_v12, %s1697_s11 }
 0x2d8   :  { %883 = vrot.lane.b32.xlu0 %v2018_v16, %s1698_s12  ;;  %923 = vrot.lane.b32.xlu1 %v2016_v15, %s1697_s11 }
 0x2dc   :  { %791 = vrot.lane.b32.xlu0 %v2010_v12, %s1700_s0  ;;  %919 = vrot.lane.b32.xlu1 %v2024_v17, %s1697_s11 }
 0x2e0   :  { %795 = vrot.lane.b32.xlu0 %v2018_v16, %s1700_s0  ;;  %881 = vrot.lane.b32.xlu1 %v2016_v15, %s1698_s12 }
 0x2e4   :  { %749 = vrot.lane.b32.xlu0 %v2010_v12, %s1701_s16  ;;  %877 = vrot.lane.b32.xlu1 %v2024_v17, %s1698_s12 }
 0x2e8   :  { %705 = vrot.lane.b32.xlu0 %v2024_v17, %s1702_s17  ;;  %839 = vrot.lane.b32.xlu1 %v2016_v15, %s1699_s15 }
 0x2ec   :  { %793 = vrot.lane.b32.xlu0 %v2016_v15, %s1700_s0  ;;  %835 = vrot.lane.b32.xlu1 %v2024_v17, %s1699_s15 }
 0x2f0   :  { %663 = vrot.lane.b32.xlu0 %v2024_v17, %s1704_s18  ;;  %789 = vrot.lane.b32.xlu1 %v2024_v17, %s1700_s0 }
 0x2f4   :  { %751 = vrot.lane.b32.xlu0 %v2016_v15, %s1701_s16  ;;  %841 = vrot.lane.b32.xlu1 %v2018_v16, %s1699_s15 }
 0x2f8   :  { %709 = vrot.lane.b32.xlu0 %v2016_v15, %s1702_s17  ;;  %747 = vrot.lane.b32.xlu1 %v2024_v17, %s1701_s16 }
 0x2fc   :  { %753 = vrot.lane.b32.xlu1 %v2018_v16, %s1701_s16 }
 0x300   :  { %707 = vrot.lane.b32.xlu1 %v2010_v12, %s1702_s17 }
 0x304   :  { %711 = vrot.lane.b32.xlu1 %v2018_v16, %s1702_s17 }
 0x308   :  { %665 = vrot.lane.b32.xlu1 %v2010_v12, %s1704_s18 }
 0x30c   :  { %669 = vrot.lane.b32.xlu1 %v2018_v16, %s1704_s18 }
 0x310   :  { %667 = vrot.lane.b32.xlu1 %v2016_v15, %s1704_s18 }
 0x33a   :  { %v880_v19 = vpop.permute.xlu0 %879  ;;  %v964_v20 = vpop.permute.xlu1 %963 }
 0x33e   :  { %v968_v22 = vpop.permute.xlu0 %967  ;;  %v966_v23 = vpop.permute.xlu1 %965 }
 0x33f   :  { %v970_v24 = vsel %vm397_vm0, %v964_v20, %v966_v23  ;;  %v969_v30 = vsel %vm397_vm0, %v966_v23, %v968_v22 }
 0x340   :  { %v996_v25 = vmul.f32 %v982_v21, %v970_v24  ;;  %v997_v36 = vmul.f32 %v986_v29, %v969_v30 }
 0x342   :  { %v2090_v31 = vpop.permute.xlu0 %837  ;;  %1057 = vmatprep.subr.mxu0 %v996_v25  ;;  %v962_v1 = vpop.permute.xlu1 %961 }
 0x343   :  { %v971_v32 = vsel %vm397_vm0, %v962_v1, %v964_v20  ;;  %v972_v33 = vsel %vm397_vm0, %v968_v22, %v962_v1 }
 0x344   :  { %v995_v34 = vmul.f32 %v978_v0, %v971_v32  ;;  %v998_v35 = vmul.f32 %v990_v26, %v972_v33  ;;  %v801_v0 = vld [vmem:[#allocation3 + $0x3] ss:$8 sm:$0xf] }
 0x345   :  { %v806_v1 = vrot.slane %v801_v0, %v1856_v9  ;;  %v810_v32 = vrot.slane %v801_v0, %v1854_v8 }
 0x346   :  { %v926_v38 = vpop.permute.xlu0 %925  ;;  %1058 = vmatpush1.msra.mxu0 %v995_v34  ;;  %1128 = vmatprep.subr.mxu1 %v998_v35  ;;  %v922_v39 = vpop.permute.xlu1 %921 }
 0x347   :  { %1129 = vmatpush1.msra.mxu1 %v997_v36 }
 0x34a   :  { %v884_v41 = vpop.permute.xlu0 %883  ;;  %v924_v42 = vpop.permute.xlu1 %923 }
 0x34b   :  { %v928_v43 = vsel %vm353_vm1, %v922_v39, %v924_v42  ;;  %v927_v47 = vsel %vm353_vm1, %v924_v42, %v926_v38 }
 0x34c   :  { %v954_v44 = vmul.f32 %v940_v40, %v928_v43  ;;  %v955_v54 = vmul.f32 %v944_v46, %v927_v47 }
 0x34e   :  { %v2104_v4 = vpop.permute.xlu0 %791  ;;  %1059 = vmatprep.subr.mxu0 %v954_v44  ;;  %v920_v48 = vpop.permute.xlu1 %919 }
 0x34f   :  { %v929_v49 = vsel %vm353_vm1, %v920_v48, %v922_v39  ;;  %v930_v50 = vsel %vm353_vm1, %v926_v38, %v920_v48  ;;  %v864_v38 = vrot.slane %v847_v62, %v1876_v28 }
 0x350   :  { %v953_v51 = vmul.f32 %v936_v3, %v929_v49  ;;  %v956_v52 = vmul.f32 %v948_v45, %v930_v50  ;;  %v814_v45 = vrot.slane %v801_v0, %v1874_v27 }
 0x352   :  { %v796_v55 = vpop.permute.xlu0 %795  ;;  %1060 = vmatpush1.msra.mxu0 %v953_v51  ;;  %1130 = vmatprep.subr.mxu1 %v956_v52  ;;  %v882_v56 = vpop.permute.xlu1 %881 }
 0x353   :  { %v886_v57 = vsel %vm309_vm2, %v880_v19, %v882_v56  ;;  %1131 = vmatpush1.msra.mxu1 %v955_v54  ;;  %v885_v63 = vsel %vm309_vm2, %v882_v56, %v884_v41 }
 0x354   :  { %v912_v58 = vmul.f32 %v898_v53, %v886_v57  ;;  %v913_v20 = vmul.f32 %v902_v61, %v885_v63 }
 0x356   :  { %v2118_v5 = vpop.permute.xlu0 %749  ;;  %1061 = vmatprep.subr.mxu0 %v912_v58  ;;  %v878_v6 = vpop.permute.xlu1 %877 }
 0x357   :  { %v887_v10 = vsel %vm309_vm2, %v878_v6, %v880_v19  ;;  %v888_v11 = vsel %vm309_vm2, %v884_v41, %v878_v6  ;;  %v852_v19 = vrot.slane %v847_v62, %v1856_v9  ;;  %v759_v41 = vld [vmem:[#allocation3 + $0x2] ss:$8 sm:$0xf] }
 0x358   :  { %v911_v13 = vmul.f32 %v894_v59, %v887_v10  ;;  %v914_v14 = vmul.f32 %v906_v60, %v888_v11  ;;  %v768_v3 = vrot.slane %v759_v41, %v1854_v8  ;;  %v764_v52 = vrot.slane %v759_v41, %v1856_v9 }
 0x359   :  { %v776_v53 = vrot.slane %v759_v41, %v1876_v28 }
 0x35a   :  { %v2125_v21 = vpop.permute.xlu0 %705  ;;  %1062 = vmatpush1.msra.mxu0 %v911_v13  ;;  %1132 = vmatprep.subr.mxu1 %v914_v14  ;;  %v840_v22 = vpop.permute.xlu1 %839  ;;  %v675_v14 = vld [vmem:[#allocation3] ss:$8 sm:$0xf] }
 0x35b   :  { %v844_v23 = vsel %vm265_vm3, %v2090_v31, %v840_v22  ;;  %1133 = vmatpush1.msra.mxu1 %v913_v20 }
 0x35c   :  { %v870_v24 = vmul.f32 %v856_v18, %v844_v23 }
 0x35e   :  { %1063 = vmatprep.subr.mxu0 %v870_v24  ;;  %v836_v25 = vpop.permute.xlu1 %835  ;;  %v794_v26 = vpop.permute.xlu0 %793 }
 0x35f   :  { %v845_v29 = vsel %vm265_vm3, %v836_v25, %v2090_v31  ;;  %v860_v31 = vrot.slane %v847_v62, %v1874_v27  ;;  %v797_v46 = vsel %vm217_vm4, %v794_v26, %v796_v55  ;;  %v798_v2 = vsel %vm217_vm4, %v2104_v4, %v794_v26 }
 0x360   :  { %v869_v30 = vmul.f32 %v852_v19, %v845_v29  ;;  %v825_v54 = vmul.f32 %v814_v45, %v798_v2 }
 0x362   :  { %1064 = vmatpush1.msra.mxu0 %v869_v30  ;;  %v790_v33 = vpop.permute.xlu1 %789  ;;  %v2145_v39 = vpop.permute.xlu0 %663 }
 0x363   :  { %v799_v34 = vsel %vm217_vm4, %v790_v33, %v2104_v4  ;;  %v800_v35 = vsel %vm217_vm4, %v796_v55, %v790_v33  ;;  %1065 = vmatprep.subr.mxu0 %v2010_v12  ;;  %v818_v12 = vrot.slane %v801_v0, %v1876_v28  ;;  %v772_v55 = vrot.slane %v759_v41, %v1874_v27  ;;  %v717_v4 = vld [vmem:[#allocation3 + $0x1] ss:$8 sm:$0xf] }
 0x364   :  { %v823_v36 = vmul.f32 %v806_v1, %v800_v35  ;;  %v824_v37 = vmul.f32 %v810_v32, %v799_v34  ;;  %1066 = vmatpush1.msra.mxu0 %v2024_v17  ;;  %v726_v61 = vrot.slane %v717_v4, %v1854_v8  ;;  %v722_v6 = vrot.slane %v717_v4, %v1856_v9  ;;  %v1003_v35 = vld [vmem:[%s2269_s5] sm:$0xff] }
 0x365   :  { %v826_v50 = vmul.f32 %v818_v12, %v797_v46  ;;  %v734_v10 = vrot.slane %v717_v4, %v1876_v28  ;;  %v730_v13 = vrot.slane %v717_v4, %v1874_v27  ;;  %v680_v1 = vrot.slane %v675_v14, %v1856_v9 }
 0x366   :  { %1067 = vmatprep.subr.mxu0 %v824_v37  ;;  %v842_v40 = vpop.permute.xlu1 %841  ;;  %v752_v48 = vpop.permute.xlu0 %751  ;;  %v692_v34 = vrot.slane %v675_v14, %v1876_v28 }
 0x367   :  { %v843_v42 = vsel %vm265_vm3, %v840_v22, %v842_v40  ;;  %v846_v43 = vsel %vm265_vm3, %v842_v40, %v836_v25  ;;  %1068 = vmatpush1.msra.mxu0 %v823_v36  ;;  %v756_v56 = vsel %vm173_vm5, %v2118_v5, %v752_v48  ;;  %v684_v25 = vrot.slane %v675_v14, %v1854_v8 }
 0x368   :  { %v871_v44 = vmul.f32 %v860_v31, %v843_v42  ;;  %v872_v17 = vmul.f32 %v864_v38, %v846_v43  ;;  %v688_v8 = vrot.slane %v675_v14, %v1874_v27  ;;  %v1279_v14 = vld [vmem:[#allocation8 + $0x78] sm:$0xff] }
 0x36a   :  { %1134 = vmatprep.subr.mxu1 %v872_v17  ;;  %v748_v47 = vpop.permute.xlu1 %747  ;;  %v710_v11 = vpop.permute.xlu0 %709 }
 0x36b   :  { %v757_v49 = vsel %vm173_vm5, %v748_v47, %v2118_v5  ;;  %1135 = vmatpush1.msra.mxu1 %v871_v44 }
 0x36c   :  { %v782_v51 = vmul.f32 %v768_v3, %v757_v49  ;;  %1136 = vmatprep.subr.mxu1 %v2018_v16 }
 0x36d   :  { %1137 = vmatpush1.msra.mxu1 %v2016_v15  ;;  %v783_v15 = vmul.f32 %v772_v55, %v756_v56  ;;  %v1186_v56 = vld [vmem:[%s2271_s7] sm:$0xff] }
 0x36e   :  { %1069 = vmatprep.subr.mxu0 %v782_v51  ;;  %1138 = vmatprep.subr.mxu1 %v826_v50  ;;  %v754_v57 = vpop.permute.xlu1 %753 }
 0x36f   :  { %v755_v16 = vsel %vm173_vm5, %v752_v48, %v754_v57  ;;  %v758_v58 = vsel %vm173_vm5, %v754_v57, %v748_v47  ;;  %1139 = vmatpush1.msra.mxu1 %v825_v54  ;;  %v1185_v54 = vld [vmem:[%s2270_s6] sm:$0xff]  ;;  %s1706_s6 = smov [#allocation9]  }
 0x370   :  { %v781_v59 = vmul.f32 %v764_v52, %v758_v58  ;;  %v784_v60 = vmul.f32 %v776_v53, %v755_v16  ;;  %s1475_s7 = sshll.u32 %s1706_s6, 4  ;;  %s1476_s7 = int_to_ptr.vmem [resolvable:$true] %s1475_s7 }
 0x371   :  { %s1663_s25 = scalar_lea.vmem %s1476_s7, 128  ;;  %p1668_p2 = scmp.lt.s32.totalorder %s1476_s7, %s1476_s7 }
 0x372   :  { %1070 = vmatpush1.msra.mxu0 %v781_v59  ;;  %1140 = vmatprep.subr.mxu1 %v784_v60  ;;  %v708_v62 = vpop.permute.xlu1 %707  ;;  %p1664_p1 = scmp.ne.s32.totalorder %s1476_s7, %s1663_s25  ;;  %p1669_p3 = scmp.lt.s32.totalorder %s1663_s25, %s1663_s25 }
 0x373   :  { %v715_v63 = vsel %vm129_vm6, %v2125_v21, %v708_v62  ;;  %1141 = vmatpush1.msra.mxu1 %v783_v15  ;;  %v714_v18 = vsel %vm129_vm6, %v708_v62, %v710_v11 }
 0x374   :  { %v740_v5 = vmul.f32 %v726_v61, %v715_v63  ;;  %v741_v0 = vmul.f32 %v730_v13, %v714_v18  ;;  %v1327_v13 = vld [vmem:[#allocation8 + $0x1f8] sm:$0xff]  ;;  %p1670_p4 = por %p1669_p3, %p1668_p2 }
 0x375   :  { %v1311_v18 = vld [vmem:[#allocation8 + $0x178] sm:$0xff] }
 0x376   :  { %1071 = vmatprep.subr.mxu0 %v740_v5  ;;  %v712_v20 = vpop.permute.xlu1 %711  ;;  %p1671_p5 = pnand %p1670_p4, %p1664_p1 }
 0x377   :  { %v713_v22 = vsel %vm129_vm6, %v710_v11, %v712_v20  ;;  %v716_v23 = vsel %vm129_vm6, %v712_v20, %v2125_v21  ;;  %v1295_v11 = vld [vmem:[#allocation8 + $0xf8] sm:$0xff]  ;;  %v1294_v20 = vld [vmem:[#allocation8 + $0xf0] sm:$0xff] }
 0x378   :  { %v739_v24 = vmul.f32 %v722_v6, %v716_v23  ;;  %v742_v19 = vmul.f32 %v734_v10, %v713_v22  ;;  %v1326_v22 = vld [vmem:[#allocation8 + $0x1f0] sm:$0xff] }
 0x37a   :  { %1072 = vmatpush1.msra.mxu0 %v739_v24  ;;  %1142 = vmatprep.subr.mxu1 %v742_v19  ;;  %v666_v26 = vpop.permute.xlu1 %665 }
 0x37b   :  { %v673_v29 = vsel %vm86_vm7, %v2145_v39, %v666_v26  ;;  %1143 = vmatpush1.msra.mxu1 %v741_v0  ;;  %v1278_v0 = vld [vmem:[#allocation8 + $0x70] sm:$0xff] }
 0x37c   :  { %v698_v30 = vmul.f32 %v684_v25, %v673_v29  ;;  %v1293_v29 = vld [vmem:[#allocation8 + $0xe8] sm:$0xff] }
 0x37e   :  { %1073 = vmatprep.subr.mxu0 %v698_v30  ;;  %v670_v32 = vpop.permute.xlu1 %669  ;;  %v1325_v30 = vld [vmem:[#allocation8 + $0x1e8] sm:$0xff] }
 0x37f   :  { %v674_v21 = vsel %vm86_vm7, %v670_v32, %v2145_v39 }
 0x380   :  { %v697_v33 = vmul.f32 %v680_v1, %v674_v21  ;;  %v1277_v21 = vld [vmem:[#allocation8 + $0x68] sm:$0xff] }
 0x382   :  { %1074 = vmatpush1.msra.mxu0 %v697_v33  ;;  %v668_v36 = vpop.permute.xlu1 %667  ;;  %v1309_v33 = vld [vmem:[#allocation8 + $0x168] sm:$0xff] }
 0x383   :  { %v671_v9 = vsel %vm86_vm7, %v668_v36, %v670_v32  ;;  %v672_v37 = vsel %vm86_vm7, %v666_v26, %v668_v36  ;;  %1487 = vmatmul.mubr.msk.f32.vlgmr.msra.gmra.mxu0 %vm470_vm8, %v1003_v35  ;;  %1489 = vmatprep.subr.mxu0 %v1295_v11  ;;  %v1310_v26 = vld [vmem:[#allocation8 + $0x170] sm:$0xff]  ;;  %v1308_v36 = vld [vmem:[#allocation8 + $0x160] sm:$0xff] }
 0x384   :  { %v699_v31 = vmul.f32 %v688_v8, %v672_v37  ;;  %v700_v38 = vmul.f32 %v692_v34, %v671_v9  ;;  %1490 = vmatpush3.msra.mxu0 %v1279_v14  ;;  %v1292_v8 = vld [vmem:[#allocation8 + $0xe0] sm:$0xff]  ;;  %v1291_v9 = vld [vmem:[#allocation8 + $0xd8] sm:$0xff]  ;;  %v1314_v11 = vld [vmem:[#allocation8 + $0x190] sm:$0xff] }
 0x385   :  { %1491 = vmatprep.subr.mxu0 %v1294_v20  ;;  %v1324_v34 = vld [vmem:[#allocation8 + $0x1e0] sm:$0xff]  ;;  %v1323_v37 = vld [vmem:[#allocation8 + $0x1d8] sm:$0xff]  ;;  %v1298_v14 = vld [vmem:[#allocation8 + $0x110] sm:$0xff] }
 0x386   :  { %1144 = vmatprep.subr.mxu1 %v700_v38  ;;  %1492 = vmatpush3.msra.mxu0 %v1278_v0  ;;  %v1307_v38 = vld [vmem:[#allocation8 + $0x158] sm:$0xff]  ;;  %v1313_v20 = vld [vmem:[#allocation8 + $0x188] sm:$0xff] }
 0x387   :  { %1145 = vmatpush1.msra.mxu1 %v699_v31  ;;  %1493 = vmatprep.subr.mxu0 %v1293_v29  ;;  %v1275_v31 = vld [vmem:[#allocation8 + $0x58] sm:$0xff]  ;;  %v1297_v0 = vld [vmem:[#allocation8 + $0x108] sm:$0xff]  ;;  %v1312_v29 = vld [vmem:[#allocation8 + $0x180] sm:$0xff] }
 0x388   :  { %1488 = vmatmul.mubr.msk.f32.vlgmr.msra.gmra.mxu1 %vm470_vm8, %v1003_v35  ;;  %1524 = vmatprep.subr.mxu1 %v1327_v13  ;;  %v1276_v35 = vld [vmem:[#allocation8 + $0x60] sm:$0xff]  ;;  %v1266_v13 = vld [vmem:[#allocation8 + $0x10] sm:$0xff] }
 0x389   :  { %1525 = vmatpush3.msra.mxu1 %v1311_v18  ;;  %1494 = vmatpush3.msra.mxu0 %v1277_v21  ;;  %v1281_v18 = vld [vmem:[#allocation8 + $0x88] sm:$0xff] }
 0x38a   :  { %1526 = vmatprep.subr.mxu1 %v1326_v22  ;;  %1495 = vmatprep.subr.mxu0 %v1292_v8  ;;  %v1265_v22 = vld [vmem:[#allocation8 + $0x8] sm:$0xff] }
 0x38b   :  { %1527 = vmatpush3.msra.mxu1 %v1310_v26  ;;  %1496 = vmatpush3.msra.mxu0 %v1276_v35  ;;  %v1280_v26 = vld [vmem:[#allocation8 + $0x80] sm:$0xff] }
 0x38c   :  { %1528 = vmatprep.subr.mxu1 %v1325_v30  ;;  %1497 = vmatprep.subr.mxu0 %v1291_v9  ;;  %v1264_v30 = vld [vmem:[#allocation8] sm:$0xff] }
 0x38d   :  { %1529 = vmatpush3.msra.mxu1 %v1309_v33  ;;  %1498 = vmatpush3.msra.mxu0 %v1275_v31 }
 0x38e   :  { %1530 = vmatprep.subr.mxu1 %v1324_v34 }
 0x38f   :  { %1531 = vmatpush3.msra.mxu1 %v1308_v36 }
 0x390   :  { %1532 = vmatprep.subr.mxu1 %v1323_v37 }
 0x391   :  { %1533 = vmatpush3.msra.mxu1 %v1307_v38 }
 0x443   :  { %v1109_v27 = vpop.f32.mrf.mxu0 }
 0x444   :  { %v1192_v28 = vmul.f32 %v1109_v27, %v1109_v27 }
 0x445   :  { %v1111_v39 = vpop.f32.mrf.mxu0 }
 0x446   :  { %v1187_v40 = vadd.f32 %v1111_v39, %v1109_v27  ;;  %v1193_v41 = vmul.f32 %v1111_v39, %v1111_v39 }
 0x448   :  { %v1180_v42 = vpop.f32.mrf.mxu1  ;;  %v1196_v43 = vadd.f32 %v1193_v41, %v1192_v28  ;;  %v1322_v28 = vld [vmem:[#allocation8 + $0x1d0] sm:$0xff]  ;;  %v1289_v41 = vld [vmem:[#allocation8 + $0xc8] sm:$0xff] }
 0x449   :  { %v1194_v12 = vmul.f32 %v1180_v42, %v1180_v42  ;;  %v1188_v44 = vadd.f32 %v1187_v40, %v1180_v42  ;;  %v1306_v40 = vld [vmem:[#allocation8 + $0x150] sm:$0xff]  ;;  %1534 = vmatprep.subr.mxu1 %v1322_v28 }
 0x44a   :  { %v1182_v17 = vpop.f32.mrf.mxu1  ;;  %1535 = vmatpush3.msra.mxu1 %v1306_v40 }
 0x44b   :  { %v1189_v3 = vadd.f32 %v1188_v44, %v1182_v17  ;;  %v1195_v45 = vmul.f32 %v1182_v17, %v1182_v17  ;;  %v1197_v46 = vadd.f32 %v1196_v43, %v1194_v12  ;;  %v1273_v43 = vld [vmem:[#allocation8 + $0x48] sm:$0xff]  ;;  %v1288_v44 = vld [vmem:[#allocation8 + $0xc0] sm:$0xff] }
 0x44c   :  { %v1305_v12 = vld [vmem:[#allocation8 + $0x148] sm:$0xff] }
 0x44d   :  { %1190 = vadd.xlane.f32.xlu0 %v1189_v3  ;;  %v1198_v2 = vadd.f32 %v1197_v46, %v1195_v45  ;;  %v1272_v3 = vld [vmem:[#allocation8 + $0x40] sm:$0xff]  ;;  %v1287_v46 = vld [vmem:[#allocation8 + $0xb8] sm:$0xff] }
 0x44e   :  { %v1304_v45 = vld [vmem:[#allocation8 + $0x140] sm:$0xff] }
 0x44f   :  { %1199 = vadd.xlane.f32.xlu1 %v1198_v2  ;;  %v1319_v2 = vld [vmem:[#allocation8 + $0x1b8] sm:$0xff] }
 0x4d6   :  { %v1191_v47 = vpop.xlane.xlu0 %1190 }
 0x4d7   :  { %v1201_v48 = vmul.f32 0.001953125, %v1191_v47  ;;  %v1271_v47 = vld [vmem:[#allocation8 + $0x38] sm:$0xff] }
 0x4d8   :  { %v1200_v49 = vpop.xlane.xlu1 %1199 }
 0x4d9   :  { %v1203_v50 = vmul.f32 %v1201_v48, %v1201_v48  ;;  %v1202_v51 = vmul.f32 0.001953125, %v1200_v49  ;;  %v1286_v49 = vld [vmem:[#allocation8 + $0xb0] sm:$0xff] }
 0x4db   :  { %v1204_v52 = vsub.f32 %v1202_v51, %v1203_v50  ;;  %v1318_v50 = vld [vmem:[#allocation8 + $0x1b0] sm:$0xff] }
 0x4dc   :  { %v1270_v51 = vld [vmem:[#allocation8 + $0x30] sm:$0xff] }
 0x4dd   :  { %v1205_v53 = vadd.f32 1e-05, %v1204_v52  ;;  %v1302_v52 = vld [vmem:[#allocation8 + $0x130] sm:$0xff] }
 0x4df   :  { %1601 = vrsqrt.f32 %v1205_v53  ;;  %v1285_v53 = vld [vmem:[#allocation8 + $0xa8] sm:$0xff] }
 0x4ec   :  { %v1602_v55 = vpop.eup %1601 }
 0x4ed   :  { %v1207_v4 = vmul.f32 %v1602_v55, %v1185_v54  ;;  %v1317_v54 = vld [vmem:[#allocation8 + $0x1a8] sm:$0xff] }
 0x4ee   :  { %v1269_v55 = vld [vmem:[#allocation8 + $0x28] sm:$0xff] }
 0x4ef   :  { %1212 = vperm.xlu0 %1577, %v1207_v4   ;;  %v1208_v57 = vmul.f32 %v1207_v4, %v1201_v48  ;;  %v1303_v48 = vld [vmem:[#allocation8 + $0x138] sm:$0xff]  ;;  %v1301_v4 = vld [vmem:[#allocation8 + $0x128] sm:$0xff] }
 0x4f1   :  { %v1209_v16 = vsub.f32 %v1186_v56, %v1208_v57  ;;  %v1284_v56 = vld [vmem:[#allocation8 + $0xa0] sm:$0xff] }
 0x4f2   :  { %v1316_v57 = vld [vmem:[#allocation8 + $0x1a0] sm:$0xff] }
 0x4f3   :  { %1221 = vperm.xlu1 %1578, %v1209_v16   ;;  %v1268_v16 = vld [vmem:[#allocation8 + $0x20] sm:$0xff] }
 0x56a   :  { %v1213_v58 = vpop.permute.xlu0 %1212 }
 0x56b   :  { %v1215_v59 = vmul.f32 %v1213_v58, %v1109_v27  ;;  %v1216_v60 = vmul.f32 %v1213_v58, %v1111_v39  ;;  %v1217_v61 = vmul.f32 %v1213_v58, %v1180_v42  ;;  %v1218_v15 = vmul.f32 %v1213_v58, %v1182_v17  ;;  %v1290_v27 = vld [vmem:[#allocation8 + $0xd0] sm:$0xff]  ;;  %v1321_v42 = vld [vmem:[#allocation8 + $0x1c8] sm:$0xff]  ;;  %v1320_v17 = vld [vmem:[#allocation8 + $0x1c0] sm:$0xff] }
 0x56c   :  { %v1274_v39 = vld [vmem:[#allocation8 + $0x50] sm:$0xff]  ;;  %1499 = vmatprep.subr.mxu0 %v1290_v27  ;;  %1536 = vmatprep.subr.mxu1 %v1321_v42  ;;  %v1300_v58 = vld [vmem:[#allocation8 + $0x120] sm:$0xff] }
 0x56d   :  { %1500 = vmatpush3.msra.mxu0 %v1274_v39  ;;  %1537 = vmatpush3.msra.mxu1 %v1305_v12 }
 0x56e   :  { %v1222_v62 = vpop.permute.xlu1 %1221  ;;  %1501 = vmatprep.subr.mxu0 %v1289_v41  ;;  %1538 = vmatprep.subr.mxu1 %v1320_v17 }
 0x56f   :  { %v2213_v63 = vadd.f32 %v1222_v62, %v1215_v59  ;;  %v2215_v5 = vadd.f32 %v1222_v62, %v1216_v60  ;;  %v2217_v6 = vadd.f32 %v1222_v62, %v1217_v61  ;;  %v2219_v10 = vadd.f32 %v1222_v62, %v1218_v15  ;;  %1502 = vmatpush3.msra.mxu0 %v1273_v43  ;;  %v1283_v59 = vld [vmem:[#allocation8 + $0x98] sm:$0xff]  ;;  %v1282_v62 = vld [vmem:[#allocation8 + $0x90] sm:$0xff] }
 0x570   :  { %1503 = vmatprep.subr.mxu0 %v1288_v44  ;;  %1539 = vmatpush3.msra.mxu1 %v1304_v45  ;;  %v1315_v60 = vld [vmem:[#allocation8 + $0x198] sm:$0xff] }
 0x571   :  { %v1230_v23 = vmax.f32 %v2217_v6, 0.0  ;;  %v1231_v24 = vmax.f32 %v2219_v10, 0.0  ;;  %v1228_v19 = vmax.f32 %v2213_v63, 0.0  ;;  %v1229_v25 = vmax.f32 %v2215_v5, 0.0  ;;  %1504 = vmatpush3.msra.mxu0 %v1272_v3  ;;  %1540 = vmatprep.subr.mxu1 %v1319_v2  ;;  %v1267_v61 = vld [vmem:[#allocation8 + $0x18] sm:$0xff] }
 0x572   :  { %1505 = vmatprep.subr.mxu0 %v1287_v46  ;;  %1541 = vmatpush3.msra.mxu1 %v1303_v48  ;;  %v1299_v15 = vld [vmem:[#allocation8 + $0x118] sm:$0xff] }
 0x573   :  { %v1584_v1 = vpack.i.bf16 %v1231_v24, %v1230_v23  ;;  %v1579_v32 = vpack.i.bf16 %v1229_v25, %v1228_v19  ;;  %1506 = vmatpush3.msra.mxu0 %v1271_v47  ;;  %1542 = vmatprep.subr.mxu1 %v1318_v50 }
 0x574   :  { %1507 = vmatprep.subr.mxu0 %v1286_v49  ;;  %1543 = vmatpush3.msra.mxu1 %v1302_v52 }
 0x575   :  { %1585 = vrot.lane.b32.xlu1 %v1584_v1, %s1699_s15  ;;  %1580 = vrot.lane.b32.xlu0 %v1579_v32, %s1699_s15  ;;  %v1296_v1 = vld [vmem:[#allocation8 + $0x100] sm:$0xff] }
 0x576   :  { %1508 = vmatpush3.msra.mxu0 %v1270_v51  ;;  %1544 = vmatprep.subr.mxu1 %v1317_v54 }
 0x577   :  { %1509 = vmatprep.subr.mxu0 %v1285_v53  ;;  %1545 = vmatpush3.msra.mxu1 %v1301_v4 }
 0x578   :  { %1510 = vmatpush3.msra.mxu0 %v1269_v55  ;;  %1546 = vmatprep.subr.mxu1 %v1316_v57 }
 0x579   :  { %1511 = vmatprep.subr.mxu0 %v1284_v56  ;;  %1547 = vmatpush3.msra.mxu1 %v1300_v58 }
 0x57a   :  { %1512 = vmatpush3.msra.mxu0 %v1268_v16  ;;  %1548 = vmatprep.subr.mxu1 %v1315_v60 }
 0x57b   :  { %1513 = vmatprep.subr.mxu0 %v1283_v59  ;;  %1549 = vmatpush3.msra.mxu1 %v1299_v15 }
 0x57c   :  { %1514 = vmatpush3.msra.mxu0 %v1267_v61  ;;  %1550 = vmatprep.subr.mxu1 %v1314_v11 }
 0x57d   :  { %1515 = vmatprep.subr.mxu0 %v1282_v62  ;;  %1551 = vmatpush3.msra.mxu1 %v1298_v14 }
 0x57e   :  { %1516 = vmatpush3.msra.mxu0 %v1266_v13  ;;  %1552 = vmatprep.subr.mxu1 %v1313_v20 }
 0x57f   :  { %1517 = vmatprep.subr.mxu0 %v1281_v18  ;;  %1553 = vmatpush3.msra.mxu1 %v1297_v0 }
 0x580   :  { %1518 = vmatpush3.msra.mxu0 %v1265_v22  ;;  %1554 = vmatprep.subr.mxu1 %v1312_v29 }
 0x581   :  { %1519 = vmatprep.subr.mxu0 %v1280_v26  ;;  %1555 = vmatpush3.msra.mxu1 %v1296_v1 }
 0x582   :  { %1520 = vmatpush3.msra.mxu0 %v1264_v30 }
 0x5e7   :  { %v1586_v32 = vpop.permute.xlu1 %1585  ;;  %v1581_v21 = vpop.permute.xlu0 %1580 }
 0x5e8   :  { %v1588_v33 = vunpack.i.h.bf16 %v1586_v32  ;;  %v1587_v8 = vunpack.i.l.bf16 %v1586_v32  ;;  %v1583_v34 = vunpack.i.h.bf16 %v1581_v21  ;;  %v1582_v35 = vunpack.i.l.bf16 %v1581_v21 }
 0x5ea   :  { %v1240_v36 = vsel %vm265_vm3, %v1587_v8, %v1588_v33  ;;  %v1241_v9 = vsel %vm265_vm3, %v1583_v34, %v1587_v8  ;;  %v1242_v37 = vsel %vm265_vm3, %v1582_v35, %v1583_v34  ;;  %v1243_v31 = vsel %vm265_vm3, %v1588_v33, %v1582_v35 }
 0x5eb   :  { %v1246_v38 = vmax.f32 %v1230_v23, %v1240_v36  ;;  %v1247_v27 = vmax.f32 %v1231_v24, %v1243_v31  ;;  %v1244_v28 = vmax.f32 %v1228_v19, %v1242_v37  ;;  %v1245_v39 = vmax.f32 %v1229_v25, %v1241_v9 }
 0x5ed   :  { %v1594_v40 = vpack.i.bf16 %v1247_v27, %v1246_v38  ;;  %v1589_v41 = vpack.i.bf16 %v1245_v39, %v1244_v28 }
 0x5ef   :  { %1595 = vrot.lane.b32.xlu1 %v1594_v40, %s1697_s11  ;;  %1590 = vrot.lane.b32.xlu0 %v1589_v41, %s1697_s11 }
 0x661   :  { %v1596_v42 = vpop.permute.xlu1 %1595  ;;  %v1591_v43 = vpop.permute.xlu0 %1590 }
 0x662   :  { %v1598_v12 = vunpack.i.h.bf16 %v1596_v42  ;;  %v1597_v6 = vunpack.i.l.bf16 %v1596_v42  ;;  %v1593_v23 = vunpack.i.h.bf16 %v1591_v43  ;;  %v1592_v44 = vunpack.i.l.bf16 %v1591_v43 }
 0x664   :  { %v1256_v10 = vsel %vm353_vm1, %v1597_v6, %v1598_v12  ;;  %v1258_v63 = vsel %vm353_vm1, %v1592_v44, %v1593_v23  ;;  %v1257_v5 = vsel %vm353_vm1, %v1593_v23, %v1597_v6  ;;  %v1259_v24 = vsel %vm353_vm1, %v1598_v12, %v1592_v44 }
 0x665   :  { %v1262_v19 = vmax.f32 %v1246_v38, %v1256_v10  ;;  %v1260_v25 = vmax.f32 %v1244_v28, %v1258_v63  ;;  %v1261_v17 = vmax.f32 %v1245_v39, %v1257_v5  ;;  %v1263_v3 = vmax.f32 %v1247_v27, %v1259_v24 }
 0x667   :  { %1392 = vmatprep.mubr.f32.mxu0 %v1261_v17  ;;  %1462 = vmatprep.mubr.f32.mxu1 %v1263_v3 }
 0x668   :  { %1393 = vmatmul.mubr.f32.vlgmr.msra.gmra.mxu0 %v1260_v25  ;;  %1463 = vmatmul.mubr.f32.vlgmr.msra.gmra.mxu1 %v1262_v19 }
 0x728   :  { %v1521_v45 = vpop.f32.mrf.mxu0  ;;  %v1556_v46 = vpop.f32.mrf.mxu1 }
 0x72a   :  { %v1522_v2 = vpop.f32.mrf.mxu0  ;;  %v1557_v47 = vpop.f32.mrf.mxu1 }
 0x72b   :  { %v1523_v48 = vadd.f32 %v1522_v2, %v1521_v45  ;;  %v1558_v49 = vadd.f32 %v1557_v47, %v1556_v46 }
 0x72d   :  { %v1465_v50 = vadd.f32 %v1558_v49, %v1523_v48 }
 0x72f   :  { %1468 = vst [vmem:[#allocation9] sm:$0xff] %v1465_v50 }
 0x730   :  { %1674 = shalt.err (!%p1671_p5)
}
 0x731   :  { %1478 = dma.vmem_to_hbm [thread:$0]  %s1476_s7, 128, %s2273_s9, [#allocation5]  }
 0x732   :  { %1687 = dma.done.wait [#allocation5], 128  }
 0x733   :  { %1688 = vsyncadd [#allocation5], 4294967168 }
 0x734   :  { %1482 = vsyncpa [#allocation4], 1 }
 0x735   :  { %1483 = vsyncpa [#allocation7], 1 }
 0x736   :  { %1484 = vsyncpa [#allocation5], 1 }

</bundles_post_ra>
